<compile_context>
chip_gen: v5e
topology: v5e:2x2
jax: 0.10.0
libtpu: 0.0.40
codegen_flags: <defaults>
</compile_context>

<pallas_src>
import functools

import jax
import jax.numpy as jnp
from jax.experimental import pallas as pl
from jax.experimental.pallas import tpu as pltpu


def _exclusion_level_kernel(img1_ref, img2_ref, out_ref, prev_ref, *, compute_dtype):
    """One (1, C, TH, W) row-tile of one image pair per grid step.

    Accumulates the 9 channel-pair sums for the x- and y-gradient directions
    into the batch-resident (1, 2, C, C) output block.
    """
    C = img1_ref.shape[1]
    TH = img1_ref.shape[2]
    t = pl.program_id(1)

    a1 = img1_ref[0]          # (C, TH, W): rows on sublanes, W on lanes -> dense vregs
    a2 = img2_ref[0]

    @pl.when(t == 0)
    def _init():
        out_ref[...] = jnp.zeros_like(out_ref)

    def remap_sq(d):
        # (sigmoid(d) * 2 - 1)**2 == tanh(d / 2)**2 : a single EUP op per element.
        # tanh/square run in compute_dtype (bf16 on v6e/v7x); sums stay f32.
        th = jnp.tanh((0.5 * d).astype(compute_dtype))
        return (th * th).astype(jnp.float32)

    def pair_sums(g1, g2):
        # S[i, j] = sum over pixels of g2[i] * g1[j], for all 9 channel pairs.
        prod = g2[:, None, :, :] * g1[None, :, :, :]          # (C, C, R, Wd) f32
        return jnp.sum(jnp.sum(prod, axis=-1), axis=-1)       # (C, C)

    # ---- y-direction (along W, the lane axis): plain lane slice, no wrap mask ----
    gy1 = remap_sq(a1[:, :, 1:] - a1[:, :, :-1])
    gy2 = remap_sq(a2[:, :, 1:] - a2[:, :, :-1])
    out_ref[0, 1] += pair_sums(gy1, gy2)

    # ---- x-direction (along H): interior rows of this tile ----
    gx1 = remap_sq(a1[:, 1:, :] - a1[:, :-1, :])
    gx2 = remap_sq(a2[:, 1:, :] - a2[:, :-1, :])
    out_ref[0, 0] += pair_sums(gx1, gx2)

    # ---- x-direction halo: last row of the previous tile vs. row 0 of this one ----
    @pl.when(t > 0)
    def _halo():
        h1 = remap_sq(a1[:, 0, :] - prev_ref[0])              # (C, W)
        h2 = remap_sq(a2[:, 0, :] - prev_ref[1])
        out_ref[0, 0] += jnp.sum(h2[:, None, :] * h1[None, :, :], axis=-1)

    # Carry this tile's last rows for the next tile's halo (read above happens first).
    prev_ref[0] = a1[:, TH - 1, :]
    prev_ref[1] = a2[:, TH - 1, :]


def _choose_tile_rows(H, W, max_tile_elems=32 * 1024):
    """Largest divisor of H that is a multiple of 8 with TH*W <= max_tile_elems.

    Falls back to the full height (always a legal BlockSpec: block dim == array
    dim) when the image already fits the budget or no such divisor exists.
    """
    if H * W <= max_tile_elems:
        return H
    best = None
    th = 8
    while th * W <= max_tile_elems and th < H:
        if H % th == 0:
            best = th
        th += 8
    return best if best is not None else H


def _level_pair_sums(img1, img2, compute_dtype):
    """Returns (2, 3, 3): [0] = x-gradient channel-pair sums, [1] = y-gradient."""
    B, C, H, W = img1.shape
    assert C == 3, "ExclusionLoss expects 3-channel images"
    TH = _choose_tile_rows(H, W)
    nt = H // TH

    # Derive the scoped-VMEM limit from the tile footprint (inputs double-buffered,
    # squared-gradient temporaries, 9x pair-product slab), with generous headroom.
    blk_bytes = C * TH * W * 4
    vmem_limit = int(min(max(28 * blk_bytes, 32 * 1024 * 1024), 64 * 1024 * 1024))

    out = pl.pallas_call(
        functools.partial(_exclusion_level_kernel, compute_dtype=compute_dtype),
        out_shape=jax.ShapeDtypeStruct((B, 2, C, C), jnp.float32),
        grid_spec=pltpu.PrefetchScalarGridSpec(
            num_scalar_prefetch=0,
            grid=(B, nt),
            in_specs=[
                pl.BlockSpec((1, C, TH, W), lambda b, t: (b, 0, t, 0)),
                pl.BlockSpec((1, C, TH, W), lambda b, t: (b, 0, t, 0)),
            ],
            # index_map ignores t -> block stays resident in VMEM as the accumulator.
            out_specs=pl.BlockSpec((1, 2, C, C), lambda b, t: (b, 0, 0, 0)),
            scratch_shapes=[pltpu.VMEM((2, C, W), img1.dtype)],
        ),
        compiler_params=pltpu.CompilerParams(
            dimension_semantics=("parallel", "arbitrary"),
            vmem_limit_bytes=vmem_limit,
        ),
    )(img1, img2)
    return out.sum(axis=0)        # (2, 3, 3)


def _avg_pool2(x):
    # torch.nn.AvgPool2d(2, stride=2): floor-crops odd trailing rows/cols.
    B, C, H, W = x.shape
    H2, W2 = H // 2, W // 2
    x = x[:, :, : 2 * H2, : 2 * W2]
    return x.reshape(B, C, H2, 2, W2, 2).mean(axis=(3, 5))


def _default_compute_dtype():
    # bf16 transcendentals only where the VPU/EUP support bf16 natively (v6e / v7x).
    try:
        kind = jax.devices()[0].device_kind.lower()
    except Exception:
        return jnp.float32
    if ("v6" in kind) or ("v7" in kind) or ("7x" in kind):
        return jnp.bfloat16
    return jnp.float32


@functools.partial(jax.jit, static_argnames=("level", "compute_dtype"))
def _exclusion_loss_impl(img1, img2, level, compute_dtype):
    gradx_total = jnp.float32(0.0)
    grady_total = jnp.float32(0.0)
    for l in range(level):
        B, C, H, W = img1.shape
        sums = _level_pair_sums(img1, img2, compute_dtype)   # (2, 3, 3)
        nx = B * (H - 1) * W                                 # elems per gradx channel slice
        ny = B * H * (W - 1)                                 # elems per grady channel slice
        gradx_total = gradx_total + jnp.sum((sums[0] / nx) ** 0.25)
        grady_total = grady_total + jnp.sum((sums[1] / ny) ** 0.25)
        if l < level - 1:                                    # last level's pool is unused
            img1 = _avg_pool2(img1)
            img2 = _avg_pool2(img2)
    loss = gradx_total / (level * 9) + grady_total / (level * 9)
    return loss / 2.0


def exclusion_loss(img1, img2, level=3, compute_dtype=None):
    # alphax = alphay = 1, exactly as in the reference PyTorch module.
    assert img1.shape == img2.shape
    if compute_dtype is None:
        compute_dtype = _default_compute_dtype()
    return _exclusion_loss_impl(img1, img2, level=level, compute_dtype=compute_dtype)


def _reference_loss(img1, img2, level=3):
    # Pure-JAX transliteration of the PyTorch forward, for verification.
    def sig2(x):
        return jax.nn.sigmoid(x) * 2.0 - 1.0

    gx_terms, gy_terms = [], []
    for _ in range(level):
        gradx1 = img1[:, :, 1:, :] - img1[:, :, :-1, :]
        grady1 = img1[:, :, :, 1:] - img1[:, :, :, :-1]
        gradx2 = img2[:, :, 1:, :] - img2[:, :, :-1, :]
        grady2 = img2[:, :, :, 1:] - img2[:, :, :, :-1]
        gx1, gy1 = sig2(gradx1), sig2(grady1)
        gx2, gy2 = sig2(gradx2), sig2(grady2)
        for i in range(3):
            for j in range(3):
                gx_terms.append(jnp.mean(gx1[:, j] ** 2 * gx2[:, i] ** 2) ** 0.25)
                gy_terms.append(jnp.mean(gy1[:, j] ** 2 * gy2[:, i] ** 2) ** 0.25)
        img1 = _avg_pool2(img1)
        img2 = _avg_pool2(img2)
    return (sum(gx_terms) / (level * 9) + sum(gy_terms) / (level * 9)) / 2.0


if __name__ == "__main__":
    key = jax.random.PRNGKey(0)
    k1, k2 = jax.random.split(key)
    # ExclusionLoss has no learnable parameters (AvgPool2d / Sigmoid only).
    img1 = jax.random.normal(k1, (2, 3, 16, 16), dtype=jnp.float32)
    img2 = jax.random.normal(k2, (2, 3, 16, 16), dtype=jnp.float32)

    cdt = _default_compute_dtype()
    loss = exclusion_loss(img1, img2, level=3, compute_dtype=cdt)
    loss = jax.block_until_ready(loss)

    ref = _reference_loss(img1, img2, level=3)
    tol = 2e-3 if cdt == jnp.float32 else 6e-3
    assert jnp.allclose(loss, ref, rtol=tol, atol=1e-5), (float(loss), float(ref))
    print("KERNEL_OK")
</pallas_src>

<mosaic_0001>
module attributes {stable_mosaic.version = 11 : i64} {
  func.func @_exclusion_level_kernel(%arg0: i32, %arg1: i32, %arg2: memref<1x3x8x8xf32, #tpu.memory_space<vmem>>, %arg3: memref<1x3x8x8xf32, #tpu.memory_space<vmem>>, %arg4: memref<1x2x3x3xf32, #tpu.memory_space<vmem>>, %arg5: memref<2x3x8xf32, #tpu.memory_space<vmem>>) attributes {dimension_semantics = [#tpu.dimension_semantics<parallel>, #tpu.dimension_semantics<arbitrary>], iteration_bounds = array<i64: 2, 1>, scalar_prefetch = 0 : i64, scratch_operands = 1 : i64, tpu.core_type = #tpu.core_type<tc>, window_params = [{transform_indices = @transform_0, window_bounds = array<i64: 1, 3, 8, 8>}, {transform_indices = @transform_1, window_bounds = array<i64: 1, 3, 8, 8>}, {transform_indices = @transform_2, window_bounds = array<i64: 1, 2, 3, 3>}]} {
    %c0 = arith.constant 0 : index
    %c0_0 = arith.constant 0 : index
    %c0_1 = arith.constant 0 : index
    %c0_2 = arith.constant 0 : index
    %0 = vector.load %arg2[%c0, %c0_0, %c0_1, %c0_2] : memref<1x3x8x8xf32, #tpu.memory_space<vmem>>, vector<1x3x8x8xf32>
    %1 = vector.shape_cast %0 : vector<1x3x8x8xf32> to vector<3x8x8xf32>
    %c0_3 = arith.constant 0 : index
    %c0_4 = arith.constant 0 : index
    %c0_5 = arith.constant 0 : index
    %c0_6 = arith.constant 0 : index
    %2 = vector.load %arg3[%c0_3, %c0_4, %c0_5, %c0_6] : memref<1x3x8x8xf32, #tpu.memory_space<vmem>>, vector<1x3x8x8xf32>
    %3 = vector.shape_cast %2 : vector<1x3x8x8xf32> to vector<3x8x8xf32>
    %c0_i32 = arith.constant 0 : i32
    %4 = arith.cmpi eq, %arg1, %c0_i32 : i32
    %5 = arith.extui %4 : i1 to i32
    %c0_i32_7 = arith.constant 0 : i32
    %6 = arith.cmpi ne, %5, %c0_i32_7 : i32
    scf.if %6 {
      %cst_38 = arith.constant 0.000000e+00 : f32
      %74 = vector.broadcast %cst_38 : f32 to vector<1x2x3x3xf32>
      %c0_39 = arith.constant 0 : index
      %c0_40 = arith.constant 0 : index
      %c0_41 = arith.constant 0 : index
      %c0_42 = arith.constant 0 : index
      %75 = vector.load %arg4[%c0_39, %c0_40, %c0_41, %c0_42] : memref<1x2x3x3xf32, #tpu.memory_space<vmem>>, vector<1x2x3x3xf32>
      tpu.vector_store %arg4[%c0_39, %c0_40, %c0_41, %c0_42], %74 {strides = array<i32>} : memref<1x2x3x3xf32, #tpu.memory_space<vmem>>, vector<1x2x3x3xf32>,
    } else {
    }
    %7 = vector.extract_strided_slice %1 {offsets = [0, 0, 1], sizes = [3, 8, 7], strides = [1, 1, 1]} : vector<3x8x8xf32> to vector<3x8x7xf32>
    %8 = vector.extract_strided_slice %1 {offsets = [0, 0, 0], sizes = [3, 8, 7], strides = [1, 1, 1]} : vector<3x8x8xf32> to vector<3x8x7xf32>
    %9 = arith.subf %7, %8 : vector<3x8x7xf32>
    %cst = arith.constant 5.000000e-01 : f32
    %10 = vector.broadcast %cst : f32 to vector<3x8x7xf32>
    %11 = arith.mulf %10, %9 : vector<3x8x7xf32>
    %12 = math.tanh %11 : vector<3x8x7xf32>
    %13 = arith.mulf %12, %12 : vector<3x8x7xf32>
    %14 = vector.extract_strided_slice %3 {offsets = [0, 0, 1], sizes = [3, 8, 7], strides = [1, 1, 1]} : vector<3x8x8xf32> to vector<3x8x7xf32>
    %15 = vector.extract_strided_slice %3 {offsets = [0, 0, 0], sizes = [3, 8, 7], strides = [1, 1, 1]} : vector<3x8x8xf32> to vector<3x8x7xf32>
    %16 = arith.subf %14, %15 : vector<3x8x7xf32>
    %cst_8 = arith.constant 5.000000e-01 : f32
    %17 = vector.broadcast %cst_8 : f32 to vector<3x8x7xf32>
    %18 = arith.mulf %17, %16 : vector<3x8x7xf32>
    %19 = math.tanh %18 : vector<3x8x7xf32>
    %20 = arith.mulf %19, %19 : vector<3x8x7xf32>
    %c0_9 = arith.constant 0 : index
    %c1 = arith.constant 1 : index
    %c0_10 = arith.constant 0 : index
    %c0_11 = arith.constant 0 : index
    %21 = vector.load %arg4[%c0_9, %c1, %c0_10, %c0_11] : memref<1x2x3x3xf32, #tpu.memory_space<vmem>>, vector<1x1x3x3xf32>
    %22 = vector.shape_cast %21 : vector<1x1x3x3xf32> to vector<3x3xf32>
    %23 = vector.shape_cast %20 : vector<3x8x7xf32> to vector<3x1x8x7xf32>
    %24 = vector.shape_cast %13 : vector<3x8x7xf32> to vector<1x3x8x7xf32>
    %25 = vector.broadcast %23 : vector<3x1x8x7xf32> to vector<3x3x8x7xf32>
    %26 = vector.broadcast %24 : vector<1x3x8x7xf32> to vector<3x3x8x7xf32>
    %27 = arith.mulf %25, %26 : vector<3x3x8x7xf32>
    %cst_12 = arith.constant dense<0.000000e+00> : vector<3x3x8xf32>
    %28 = vector.multi_reduction <add>, %27, %cst_12 [3] : vector<3x3x8x7xf32> to vector<3x3x8xf32>
    %cst_13 = arith.constant dense<0.000000e+00> : vector<3x3xf32>
    %29 = vector.multi_reduction <add>, %28, %cst_13 [2] : vector<3x3x8xf32> to vector<3x3xf32>
    %30 = arith.addf %22, %29 : vector<3x3xf32>
    %c0_14 = arith.constant 0 : index
    %c1_15 = arith.constant 1 : index
    %c0_16 = arith.constant 0 : index
    %c0_17 = arith.constant 0 : index
    %31 = vector.load %arg4[%c0_14, %c1_15, %c0_16, %c0_17] : memref<1x2x3x3xf32, #tpu.memory_space<vmem>>, vector<1x1x3x3xf32>
    %32 = vector.shape_cast %31 : vector<1x1x3x3xf32> to vector<3x3xf32>
    %33 = vector.shape_cast %30 : vector<3x3xf32> to vector<1x1x3x3xf32>
    tpu.vector_store %arg4[%c0_14, %c1_15, %c0_16, %c0_17], %33 {strides = array<i32>} : memref<1x2x3x3xf32, #tpu.memory_space<vmem>>, vector<1x1x3x3xf32>,
    %34 = vector.extract_strided_slice %1 {offsets = [0, 1, 0], sizes = [3, 7, 8], strides = [1, 1, 1]} : vector<3x8x8xf32> to vector<3x7x8xf32>
    %35 = vector.extract_strided_slice %1 {offsets = [0, 0, 0], sizes = [3, 7, 8], strides = [1, 1, 1]} : vector<3x8x8xf32> to vector<3x7x8xf32>
    %36 = arith.subf %34, %35 : vector<3x7x8xf32>
    %cst_18 = arith.constant 5.000000e-01 : f32
    %37 = vector.broadcast %cst_18 : f32 to vector<3x7x8xf32>
    %38 = arith.mulf %37, %36 : vector<3x7x8xf32>
    %39 = math.tanh %38 : vector<3x7x8xf32>
    %40 = arith.mulf %39, %39 : vector<3x7x8xf32>
    %41 = vector.extract_strided_slice %3 {offsets = [0, 1, 0], sizes = [3, 7, 8], strides = [1, 1, 1]} : vector<3x8x8xf32> to vector<3x7x8xf32>
    %42 = vector.extract_strided_slice %3 {offsets = [0, 0, 0], sizes = [3, 7, 8], strides = [1, 1, 1]} : vector<3x8x8xf32> to vector<3x7x8xf32>
    %43 = arith.subf %41, %42 : vector<3x7x8xf32>
    %cst_19 = arith.constant 5.000000e-01 : f32
    %44 = vector.broadcast %cst_19 : f32 to vector<3x7x8xf32>
    %45 = arith.mulf %44, %43 : vector<3x7x8xf32>
    %46 = math.tanh %45 : vector<3x7x8xf32>
    %47 = arith.mulf %46, %46 : vector<3x7x8xf32>
    %c0_20 = arith.constant 0 : index
    %c0_21 = arith.constant 0 : index
    %c0_22 = arith.constant 0 : index
    %c0_23 = arith.constant 0 : index
    %48 = vector.load %arg4[%c0_20, %c0_21, %c0_22, %c0_23] : memref<1x2x3x3xf32, #tpu.memory_space<vmem>>, vector<1x1x3x3xf32>
    %49 = vector.shape_cast %48 : vector<1x1x3x3xf32> to vector<3x3xf32>
    %50 = vector.shape_cast %47 : vector<3x7x8xf32> to vector<3x1x7x8xf32>
    %51 = vector.shape_cast %40 : vector<3x7x8xf32> to vector<1x3x7x8xf32>
    %52 = vector.broadcast %50 : vector<3x1x7x8xf32> to vector<3x3x7x8xf32>
    %53 = vector.broadcast %51 : vector<1x3x7x8xf32> to vector<3x3x7x8xf32>
    %54 = arith.mulf %52, %53 : vector<3x3x7x8xf32>
    %cst_24 = arith.constant dense<0.000000e+00> : vector<3x3x7xf32>
    %55 = vector.multi_reduction <add>, %54, %cst_24 [3] : vector<3x3x7x8xf32> to vector<3x3x7xf32>
    %cst_25 = arith.constant dense<0.000000e+00> : vector<3x3xf32>
    %56 = vector.multi_reduction <add>, %55, %cst_25 [2] : vector<3x3x7xf32> to vector<3x3xf32>
    %57 = arith.addf %49, %56 : vector<3x3xf32>
    %c0_26 = arith.constant 0 : index
    %c0_27 = arith.constant 0 : index
    %c0_28 = arith.constant 0 : index
    %c0_29 = arith.constant 0 : index
    %58 = vector.load %arg4[%c0_26, %c0_27, %c0_28, %c0_29] : memref<1x2x3x3xf32, #tpu.memory_space<vmem>>, vector<1x1x3x3xf32>
    %59 = vector.shape_cast %58 : vector<1x1x3x3xf32> to vector<3x3xf32>
    %60 = vector.shape_cast %57 : vector<3x3xf32> to vector<1x1x3x3xf32>
    tpu.vector_store %arg4[%c0_26, %c0_27, %c0_28, %c0_29], %60 {strides = array<i32>} : memref<1x2x3x3xf32, #tpu.memory_space<vmem>>, vector<1x1x3x3xf32>,
    %c0_i32_30 = arith.constant 0 : i32
    %61 = arith.cmpi sgt, %arg1, %c0_i32_30 : i32
    %62 = arith.extui %61 : i1 to i32
    %c0_i32_31 = arith.constant 0 : i32
    %63 = arith.cmpi ne, %62, %c0_i32_31 : i32
    scf.if %63 {
      %74 = vector.extract_strided_slice %1 {offsets = [0, 0, 0], sizes = [3, 1, 8], strides = [1, 1, 1]} : vector<3x8x8xf32> to vector<3x1x8xf32>
      %75 = vector.shape_cast %74 : vector<3x1x8xf32> to vector<3x8xf32>
      %c0_38 = arith.constant 0 : index
      %c0_39 = arith.constant 0 : index
      %c0_40 = arith.constant 0 : index
      %76 = vector.load %arg5[%c0_38, %c0_39, %c0_40] : memref<2x3x8xf32, #tpu.memory_space<vmem>>, vector<1x3x8xf32>
      %77 = vector.shape_cast %76 : vector<1x3x8xf32> to vector<3x8xf32>
      %78 = arith.subf %75, %77 : vector<3x8xf32>
      %cst_41 = arith.constant 5.000000e-01 : f32
      %79 = vector.broadcast %cst_41 : f32 to vector<3x8xf32>
      %80 = arith.mulf %79, %78 : vector<3x8xf32>
      %81 = math.tanh %80 : vector<3x8xf32>
      %82 = arith.mulf %81, %81 : vector<3x8xf32>
      %83 = vector.extract_strided_slice %3 {offsets = [0, 0, 0], sizes = [3, 1, 8], strides = [1, 1, 1]} : vector<3x8x8xf32> to vector<3x1x8xf32>
      %84 = vector.shape_cast %83 : vector<3x1x8xf32> to vector<3x8xf32>
      %c1_42 = arith.constant 1 : index
      %c0_43 = arith.constant 0 : index
      %c0_44 = arith.constant 0 : index
      %85 = vector.load %arg5[%c1_42, %c0_43, %c0_44] : memref<2x3x8xf32, #tpu.memory_space<vmem>>, vector<1x3x8xf32>
      %86 = vector.shape_cast %85 : vector<1x3x8xf32> to vector<3x8xf32>
      %87 = arith.subf %84, %86 : vector<3x8xf32>
      %cst_45 = arith.constant 5.000000e-01 : f32
      %88 = vector.broadcast %cst_45 : f32 to vector<3x8xf32>
      %89 = arith.mulf %88, %87 : vector<3x8xf32>
      %90 = math.tanh %89 : vector<3x8xf32>
      %91 = arith.mulf %90, %90 : vector<3x8xf32>
      %c0_46 = arith.constant 0 : index
      %c0_47 = arith.constant 0 : index
      %c0_48 = arith.constant 0 : index
      %c0_49 = arith.constant 0 : index
      %92 = vector.load %arg4[%c0_46, %c0_47, %c0_48, %c0_49] : memref<1x2x3x3xf32, #tpu.memory_space<vmem>>, vector<1x1x3x3xf32>
      %93 = vector.shape_cast %92 : vector<1x1x3x3xf32> to vector<3x3xf32>
      %94 = vector.shape_cast %91 : vector<3x8xf32> to vector<3x1x8xf32>
      %95 = vector.shape_cast %82 : vector<3x8xf32> to vector<1x3x8xf32>
      %96 = vector.broadcast %94 : vector<3x1x8xf32> to vector<3x3x8xf32>
      %97 = vector.broadcast %95 : vector<1x3x8xf32> to vector<3x3x8xf32>
      %98 = arith.mulf %96, %97 : vector<3x3x8xf32>
      %cst_50 = arith.constant dense<0.000000e+00> : vector<3x3xf32>
      %99 = vector.multi_reduction <add>, %98, %cst_50 [2] : vector<3x3x8xf32> to vector<3x3xf32>
      %100 = arith.addf %93, %99 : vector<3x3xf32>
      %c0_51 = arith.constant 0 : index
      %c0_52 = arith.constant 0 : index
      %c0_53 = arith.constant 0 : index
      %c0_54 = arith.constant 0 : index
      %101 = vector.load %arg4[%c0_51, %c0_52, %c0_53, %c0_54] : memref<1x2x3x3xf32, #tpu.memory_space<vmem>>, vector<1x1x3x3xf32>
      %102 = vector.shape_cast %101 : vector<1x1x3x3xf32> to vector<3x3xf32>
      %103 = vector.shape_cast %100 : vector<3x3xf32> to vector<1x1x3x3xf32>
      tpu.vector_store %arg4[%c0_51, %c0_52, %c0_53, %c0_54], %103 {strides = array<i32>} : memref<1x2x3x3xf32, #tpu.memory_space<vmem>>, vector<1x1x3x3xf32>,
    } else {
    }
    %64 = vector.extract_strided_slice %1 {offsets = [0, 7, 0], sizes = [3, 1, 8], strides = [1, 1, 1]} : vector<3x8x8xf32> to vector<3x1x8xf32>
    %65 = vector.shape_cast %64 : vector<3x1x8xf32> to vector<3x8xf32>
    %c0_32 = arith.constant 0 : index
    %c0_33 = arith.constant 0 : index
    %c0_34 = arith.constant 0 : index
    %66 = vector.load %arg5[%c0_32, %c0_33, %c0_34] : memref<2x3x8xf32, #tpu.memory_space<vmem>>, vector<1x3x8xf32>
    %67 = vector.shape_cast %66 : vector<1x3x8xf32> to vector<3x8xf32>
    %68 = vector.shape_cast %65 : vector<3x8xf32> to vector<1x3x8xf32>
    tpu.vector_store %arg5[%c0_32, %c0_33, %c0_34], %68 {strides = array<i32>} : memref<2x3x8xf32, #tpu.memory_space<vmem>>, vector<1x3x8xf32>,
    %69 = vector.extract_strided_slice %3 {offsets = [0, 7, 0], sizes = [3, 1, 8], strides = [1, 1, 1]} : vector<3x8x8xf32> to vector<3x1x8xf32>
    %70 = vector.shape_cast %69 : vector<3x1x8xf32> to vector<3x8xf32>
    %c1_35 = arith.constant 1 : index
    %c0_36 = arith.constant 0 : index
    %c0_37 = arith.constant 0 : index
    %71 = vector.load %arg5[%c1_35, %c0_36, %c0_37] : memref<2x3x8xf32, #tpu.memory_space<vmem>>, vector<1x3x8xf32>
    %72 = vector.shape_cast %71 : vector<1x3x8xf32> to vector<3x8xf32>
    %73 = vector.shape_cast %70 : vector<3x8xf32> to vector<1x3x8xf32>
    tpu.vector_store %arg5[%c1_35, %c0_36, %c0_37], %73 {strides = array<i32>} : memref<2x3x8xf32, #tpu.memory_space<vmem>>, vector<1x3x8xf32>,
    return
  }
  func.func @transform_0(%arg0: i32, %arg1: i32) -> (i32, i32, i32, i32) {
    %c0_i32 = arith.constant 0 : i32
    %c0_i32_0 = arith.constant 0 : i32
    %c0_i32_1 = arith.constant 0 : i32
    return %arg0, %c0_i32, %arg1, %c0_i32_0 : i32, i32, i32, i32
  }
  func.func @transform_1(%arg0: i32, %arg1: i32) -> (i32, i32, i32, i32) {
    %c0_i32 = arith.constant 0 : i32
    %c0_i32_0 = arith.constant 0 : i32
    %c0_i32_1 = arith.constant 0 : i32
    return %arg0, %c0_i32, %arg1, %c0_i32_0 : i32, i32, i32, i32
  }
  func.func @transform_2(%arg0: i32, %arg1: i32) -> (i32, i32, i32, i32) {
    %c0_i32 = arith.constant 0 : i32
    %c0_i32_0 = arith.constant 0 : i32
    %c0_i32_1 = arith.constant 0 : i32
    %c0_i32_2 = arith.constant 0 : i32
    return %arg0, %c0_i32, %c0_i32_0, %c0_i32_1 : i32, i32, i32, i32
  }
}

module attributes {stable_mosaic.version = 11 : i64} {
  func.func @_exclusion_level_kernel(%arg0: i32, %arg1: i32, %arg2: memref<1x3x16x16xf32, #tpu.memory_space<vmem>>, %arg3: memref<1x3x16x16xf32, #tpu.memory_space<vmem>>, %arg4: memref<1x2x3x3xf32, #tpu.memory_space<vmem>>, %arg5: memref<2x3x16xf32, #tpu.memory_space<vmem>>) attributes {dimension_semantics = [#tpu.dimension_semantics<parallel>, #tpu.dimension_semantics<arbitrary>], iteration_bounds = array<i64: 2, 1>, scalar_prefetch = 0 : i64, scratch_operands = 1 : i64, tpu.core_type = #tpu.core_type<tc>, window_params = [{transform_indices = @transform_0, window_bounds = array<i64: 1, 3, 16, 16>}, {transform_indices = @transform_1, window_bounds = array<i64: 1, 3, 16, 16>}, {transform_indices = @transform_2, window_bounds = array<i64: 1, 2, 3, 3>}]} {
    %c0 = arith.constant 0 : index
    %c0_0 = arith.constant 0 : index
    %c0_1 = arith.constant 0 : index
    %c0_2 = arith.constant 0 : index
    %0 = vector.load %arg2[%c0, %c0_0, %c0_1, %c0_2] : memref<1x3x16x16xf32, #tpu.memory_space<vmem>>, vector<1x3x16x16xf32>
    %1 = vector.shape_cast %0 : vector<1x3x16x16xf32> to vector<3x16x16xf32>
    %c0_3 = arith.constant 0 : index
    %c0_4 = arith.constant 0 : index
    %c0_5 = arith.constant 0 : index
    %c0_6 = arith.constant 0 : index
    %2 = vector.load %arg3[%c0_3, %c0_4, %c0_5, %c0_6] : memref<1x3x16x16xf32, #tpu.memory_space<vmem>>, vector<1x3x16x16xf32>
    %3 = vector.shape_cast %2 : vector<1x3x16x16xf32> to vector<3x16x16xf32>
    %c0_i32 = arith.constant 0 : i32
    %4 = arith.cmpi eq, %arg1, %c0_i32 : i32
    %5 = arith.extui %4 : i1 to i32
    %c0_i32_7 = arith.constant 0 : i32
    %6 = arith.cmpi ne, %5, %c0_i32_7 : i32
    scf.if %6 {
      %cst_38 = arith.constant 0.000000e+00 : f32
      %74 = vector.broadcast %cst_38 : f32 to vector<1x2x3x3xf32>
      %c0_39 = arith.constant 0 : index
      %c0_40 = arith.constant 0 : index
      %c0_41 = arith.constant 0 : index
      %c0_42 = arith.constant 0 : index
      %75 = vector.load %arg4[%c0_39, %c0_40, %c0_41, %c0_42] : memref<1x2x3x3xf32, #tpu.memory_space<vmem>>, vector<1x2x3x3xf32>
      tpu.vector_store %arg4[%c0_39, %c0_40, %c0_41, %c0_42], %74 {strides = array<i32>} : memref<1x2x3x3xf32, #tpu.memory_space<vmem>>, vector<1x2x3x3xf32>,
    } else {
    }
    %7 = vector.extract_strided_slice %1 {offsets = [0, 0, 1], sizes = [3, 16, 15], strides = [1, 1, 1]} : vector<3x16x16xf32> to vector<3x16x15xf32>
    %8 = vector.extract_strided_slice %1 {offsets = [0, 0, 0], sizes = [3, 16, 15], strides = [1, 1, 1]} : vector<3x16x16xf32> to vector<3x16x15xf32>
    %9 = arith.subf %7, %8 : vector<3x16x15xf32>
    %cst = arith.constant 5.000000e-01 : f32
    %10 = vector.broadcast %cst : f32 to vector<3x16x15xf32>
    %11 = arith.mulf %10, %9 : vector<3x16x15xf32>
    %12 = math.tanh %11 : vector<3x16x15xf32>
    %13 = arith.mulf %12, %12 : vector<3x16x15xf32>
    %14 = vector.extract_strided_slice %3 {offsets = [0, 0, 1], sizes = [3, 16, 15], strides = [1, 1, 1]} : vector<3x16x16xf32> to vector<3x16x15xf32>
    %15 = vector.extract_strided_slice %3 {offsets = [0, 0, 0], sizes = [3, 16, 15], strides = [1, 1, 1]} : vector<3x16x16xf32> to vector<3x16x15xf32>
    %16 = arith.subf %14, %15 : vector<3x16x15xf32>
    %cst_8 = arith.constant 5.000000e-01 : f32
    %17 = vector.broadcast %cst_8 : f32 to vector<3x16x15xf32>
    %18 = arith.mulf %17, %16 : vector<3x16x15xf32>
    %19 = math.tanh %18 : vector<3x16x15xf32>
    %20 = arith.mulf %19, %19 : vector<3x16x15xf32>
    %c0_9 = arith.constant 0 : index
    %c1 = arith.constant 1 : index
    %c0_10 = arith.constant 0 : index
    %c0_11 = arith.constant 0 : index
    %21 = vector.load %arg4[%c0_9, %c1, %c0_10, %c0_11] : memref<1x2x3x3xf32, #tpu.memory_space<vmem>>, vector<1x1x3x3xf32>
    %22 = vector.shape_cast %21 : vector<1x1x3x3xf32> to vector<3x3xf32>
    %23 = vector.shape_cast %20 : vector<3x16x15xf32> to vector<3x1x16x15xf32>
    %24 = vector.shape_cast %13 : vector<3x16x15xf32> to vector<1x3x16x15xf32>
    %25 = vector.broadcast %23 : vector<3x1x16x15xf32> to vector<3x3x16x15xf32>
    %26 = vector.broadcast %24 : vector<1x3x16x15xf32> to vector<3x3x16x15xf32>
    %27 = arith.mulf %25, %26 : vector<3x3x16x15xf32>
    %cst_12 = arith.constant dense<0.000000e+00> : vector<3x3x16xf32>
    %28 = vector.multi_reduction <add>, %27, %cst_12 [3] : vector<3x3x16x15xf32> to vector<3x3x16xf32>
    %cst_13 = arith.constant dense<0.000000e+00> : vector<3x3xf32>
    %29 = vector.multi_reduction <add>, %28, %cst_13 [2] : vector<3x3x16xf32> to vector<3x3xf32>
    %30 = arith.addf %22, %29 : vector<3x3xf32>
    %c0_14 = arith.constant 0 : index
    %c1_15 = arith.constant 1 : index
    %c0_16 = arith.constant 0 : index
    %c0_17 = arith.constant 0 : index
    %31 = vector.load %arg4[%c0_14, %c1_15, %c0_16, %c0_17] : memref<1x2x3x3xf32, #tpu.memory_space<vmem>>, vector<1x1x3x3xf32>
    %32 = vector.shape_cast %31 : vector<1x1x3x3xf32> to vector<3x3xf32>
    %33 = vector.shape_cast %30 : vector<3x3xf32> to vector<1x1x3x3xf32>
    tpu.vector_store %arg4[%c0_14, %c1_15, %c0_16, %c0_17], %33 {strides = array<i32>} : memref<1x2x3x3xf32, #tpu.memory_space<vmem>>, vector<1x1x3x3xf32>,
    %34 = vector.extract_strided_slice %1 {offsets = [0, 1, 0], sizes = [3, 15, 16], strides = [1, 1, 1]} : vector<3x16x16xf32> to vector<3x15x16xf32>
    %35 = vector.extract_strided_slice %1 {offsets = [0, 0, 0], sizes = [3, 15, 16], strides = [1, 1, 1]} : vector<3x16x16xf32> to vector<3x15x16xf32>
    %36 = arith.subf %34, %35 : vector<3x15x16xf32>
    %cst_18 = arith.constant 5.000000e-01 : f32
    %37 = vector.broadcast %cst_18 : f32 to vector<3x15x16xf32>
    %38 = arith.mulf %37, %36 : vector<3x15x16xf32>
    %39 = math.tanh %38 : vector<3x15x16xf32>
    %40 = arith.mulf %39, %39 : vector<3x15x16xf32>
    %41 = vector.extract_strided_slice %3 {offsets = [0, 1, 0], sizes = [3, 15, 16], strides = [1, 1, 1]} : vector<3x16x16xf32> to vector<3x15x16xf32>
    %42 = vector.extract_strided_slice %3 {offsets = [0, 0, 0], sizes = [3, 15, 16], strides = [1, 1, 1]} : vector<3x16x16xf32> to vector<3x15x16xf32>
    %43 = arith.subf %41, %42 : vector<3x15x16xf32>
    %cst_19 = arith.constant 5.000000e-01 : f32
    %44 = vector.broadcast %cst_19 : f32 to vector<3x15x16xf32>
    %45 = arith.mulf %44, %43 : vector<3x15x16xf32>
    %46 = math.tanh %45 : vector<3x15x16xf32>
    %47 = arith.mulf %46, %46 : vector<3x15x16xf32>
    %c0_20 = arith.constant 0 : index
    %c0_21 = arith.constant 0 : index
    %c0_22 = arith.constant 0 : index
    %c0_23 = arith.constant 0 : index
    %48 = vector.load %arg4[%c0_20, %c0_21, %c0_22, %c0_23] : memref<1x2x3x3xf32, #tpu.memory_space<vmem>>, vector<1x1x3x3xf32>
    %49 = vector.shape_cast %48 : vector<1x1x3x3xf32> to vector<3x3xf32>
    %50 = vector.shape_cast %47 : vector<3x15x16xf32> to vector<3x1x15x16xf32>
    %51 = vector.shape_cast %40 : vector<3x15x16xf32> to vector<1x3x15x16xf32>
    %52 = vector.broadcast %50 : vector<3x1x15x16xf32> to vector<3x3x15x16xf32>
    %53 = vector.broadcast %51 : vector<1x3x15x16xf32> to vector<3x3x15x16xf32>
    %54 = arith.mulf %52, %53 : vector<3x3x15x16xf32>
    %cst_24 = arith.constant dense<0.000000e+00> : vector<3x3x15xf32>
    %55 = vector.multi_reduction <add>, %54, %cst_24 [3] : vector<3x3x15x16xf32> to vector<3x3x15xf32>
    %cst_25 = arith.constant dense<0.000000e+00> : vector<3x3xf32>
    %56 = vector.multi_reduction <add>, %55, %cst_25 [2] : vector<3x3x15xf32> to vector<3x3xf32>
    %57 = arith.addf %49, %56 : vector<3x3xf32>
    %c0_26 = arith.constant 0 : index
    %c0_27 = arith.constant 0 : index
    %c0_28 = arith.constant 0 : index
    %c0_29 = arith.constant 0 : index
    %58 = vector.load %arg4[%c0_26, %c0_27, %c0_28, %c0_29] : memref<1x2x3x3xf32, #tpu.memory_space<vmem>>, vector<1x1x3x3xf32>
    %59 = vector.shape_cast %58 : vector<1x1x3x3xf32> to vector<3x3xf32>
    %60 = vector.shape_cast %57 : vector<3x3xf32> to vector<1x1x3x3xf32>
    tpu.vector_store %arg4[%c0_26, %c0_27, %c0_28, %c0_29], %60 {strides = array<i32>} : memref<1x2x3x3xf32, #tpu.memory_space<vmem>>, vector<1x1x3x3xf32>,
    %c0_i32_30 = arith.constant 0 : i32
    %61 = arith.cmpi sgt, %arg1, %c0_i32_30 : i32
    %62 = arith.extui %61 : i1 to i32
    %c0_i32_31 = arith.constant 0 : i32
    %63 = arith.cmpi ne, %62, %c0_i32_31 : i32
    scf.if %63 {
      %74 = vector.extract_strided_slice %1 {offsets = [0, 0, 0], sizes = [3, 1, 16], strides = [1, 1, 1]} : vector<3x16x16xf32> to vector<3x1x16xf32>
      %75 = vector.shape_cast %74 : vector<3x1x16xf32> to vector<3x16xf32>
      %c0_38 = arith.constant 0 : index
      %c0_39 = arith.constant 0 : index
      %c0_40 = arith.constant 0 : index
      %76 = vector.load %arg5[%c0_38, %c0_39, %c0_40] : memref<2x3x16xf32, #tpu.memory_space<vmem>>, vector<1x3x16xf32>
      %77 = vector.shape_cast %76 : vector<1x3x16xf32> to vector<3x16xf32>
      %78 = arith.subf %75, %77 : vector<3x16xf32>
      %cst_41 = arith.constant 5.000000e-01 : f32
      %79 = vector.broadcast %cst_41 : f32 to vector<3x16xf32>
      %80 = arith.mulf %79, %78 : vector<3x16xf32>
      %81 = math.tanh %80 : vector<3x16xf32>
      %82 = arith.mulf %81, %81 : vector<3x16xf32>
      %83 = vector.extract_strided_slice %3 {offsets = [0, 0, 0], sizes = [3, 1, 16], strides = [1, 1, 1]} : vector<3x16x16xf32> to vector<3x1x16xf32>
      %84 = vector.shape_cast %83 : vector<3x1x16xf32> to vector<3x16xf32>
      %c1_42 = arith.constant 1 : index
      %c0_43 = arith.constant 0 : index
      %c0_44 = arith.constant 0 : index
      %85 = vector.load %arg5[%c1_42, %c0_43, %c0_44] : memref<2x3x16xf32, #tpu.memory_space<vmem>>, vector<1x3x16xf32>
      %86 = vector.shape_cast %85 : vector<1x3x16xf32> to vector<3x16xf32>
      %87 = arith.subf %84, %86 : vector<3x16xf32>
      %cst_45 = arith.constant 5.000000e-01 : f32
      %88 = vector.broadcast %cst_45 : f32 to vector<3x16xf32>
      %89 = arith.mulf %88, %87 : vector<3x16xf32>
      %90 = math.tanh %89 : vector<3x16xf32>
      %91 = arith.mulf %90, %90 : vector<3x16xf32>
      %c0_46 = arith.constant 0 : index
      %c0_47 = arith.constant 0 : index
      %c0_48 = arith.constant 0 : index
      %c0_49 = arith.constant 0 : index
      %92 = vector.load %arg4[%c0_46, %c0_47, %c0_48, %c0_49] : memref<1x2x3x3xf32, #tpu.memory_space<vmem>>, vector<1x1x3x3xf32>
      %93 = vector.shape_cast %92 : vector<1x1x3x3xf32> to vector<3x3xf32>
      %94 = vector.shape_cast %91 : vector<3x16xf32> to vector<3x1x16xf32>
      %95 = vector.shape_cast %82 : vector<3x16xf32> to vector<1x3x16xf32>
      %96 = vector.broadcast %94 : vector<3x1x16xf32> to vector<3x3x16xf32>
      %97 = vector.broadcast %95 : vector<1x3x16xf32> to vector<3x3x16xf32>
      %98 = arith.mulf %96, %97 : vector<3x3x16xf32>
      %cst_50 = arith.constant dense<0.000000e+00> : vector<3x3xf32>
      %99 = vector.multi_reduction <add>, %98, %cst_50 [2] : vector<3x3x16xf32> to vector<3x3xf32>
      %100 = arith.addf %93, %99 : vector<3x3xf32>
      %c0_51 = arith.constant 0 : index
      %c0_52 = arith.constant 0 : index
      %c0_53 = arith.constant 0 : index
      %c0_54 = arith.constant 0 : index
      %101 = vector.load %arg4[%c0_51, %c0_52, %c0_53, %c0_54] : memref<1x2x3x3xf32, #tpu.memory_space<vmem>>, vector<1x1x3x3xf32>
      %102 = vector.shape_cast %101 : vector<1x1x3x3xf32> to vector<3x3xf32>
      %103 = vector.shape_cast %100 : vector<3x3xf32> to vector<1x1x3x3xf32>
      tpu.vector_store %arg4[%c0_51, %c0_52, %c0_53, %c0_54], %103 {strides = array<i32>} : memref<1x2x3x3xf32, #tpu.memory_space<vmem>>, vector<1x1x3x3xf32>,
    } else {
    }
    %64 = vector.extract_strided_slice %1 {offsets = [0, 15, 0], sizes = [3, 1, 16], strides = [1, 1, 1]} : vector<3x16x16xf32> to vector<3x1x16xf32>
    %65 = vector.shape_cast %64 : vector<3x1x16xf32> to vector<3x16xf32>
    %c0_32 = arith.constant 0 : index
    %c0_33 = arith.constant 0 : index
    %c0_34 = arith.constant 0 : index
    %66 = vector.load %arg5[%c0_32, %c0_33, %c0_34] : memref<2x3x16xf32, #tpu.memory_space<vmem>>, vector<1x3x16xf32>
    %67 = vector.shape_cast %66 : vector<1x3x16xf32> to vector<3x16xf32>
    %68 = vector.shape_cast %65 : vector<3x16xf32> to vector<1x3x16xf32>
    tpu.vector_store %arg5[%c0_32, %c0_33, %c0_34], %68 {strides = array<i32>} : memref<2x3x16xf32, #tpu.memory_space<vmem>>, vector<1x3x16xf32>,
    %69 = vector.extract_strided_slice %3 {offsets = [0, 15, 0], sizes = [3, 1, 16], strides = [1, 1, 1]} : vector<3x16x16xf32> to vector<3x1x16xf32>
    %70 = vector.shape_cast %69 : vector<3x1x16xf32> to vector<3x16xf32>
    %c1_35 = arith.constant 1 : index
    %c0_36 = arith.constant 0 : index
    %c0_37 = arith.constant 0 : index
    %71 = vector.load %arg5[%c1_35, %c0_36, %c0_37] : memref<2x3x16xf32, #tpu.memory_space<vmem>>, vector<1x3x16xf32>
    %72 = vector.shape_cast %71 : vector<1x3x16xf32> to vector<3x16xf32>
    %73 = vector.shape_cast %70 : vector<3x16xf32> to vector<1x3x16xf32>
    tpu.vector_store %arg5[%c1_35, %c0_36, %c0_37], %73 {strides = array<i32>} : memref<2x3x16xf32, #tpu.memory_space<vmem>>, vector<1x3x16xf32>,
    return
  }
  func.func @transform_0(%arg0: i32, %arg1: i32) -> (i32, i32, i32, i32) {
    %c0_i32 = arith.constant 0 : i32
    %c0_i32_0 = arith.constant 0 : i32
    %c0_i32_1 = arith.constant 0 : i32
    return %arg0, %c0_i32, %arg1, %c0_i32_0 : i32, i32, i32, i32
  }
  func.func @transform_1(%arg0: i32, %arg1: i32) -> (i32, i32, i32, i32) {
    %c0_i32 = arith.constant 0 : i32
    %c0_i32_0 = arith.constant 0 : i32
    %c0_i32_1 = arith.constant 0 : i32
    return %arg0, %c0_i32, %arg1, %c0_i32_0 : i32, i32, i32, i32
  }
  func.func @transform_2(%arg0: i32, %arg1: i32) -> (i32, i32, i32, i32) {
    %c0_i32 = arith.constant 0 : i32
    %c0_i32_0 = arith.constant 0 : i32
    %c0_i32_1 = arith.constant 0 : i32
    %c0_i32_2 = arith.constant 0 : i32
    return %arg0, %c0_i32, %c0_i32_0, %c0_i32_1 : i32, i32, i32, i32
  }
}

module attributes {stable_mosaic.version = 11 : i64} {
  func.func @_exclusion_level_kernel(%arg0: i32, %arg1: i32, %arg2: memref<1x3x4x4xf32, #tpu.memory_space<vmem>>, %arg3: memref<1x3x4x4xf32, #tpu.memory_space<vmem>>, %arg4: memref<1x2x3x3xf32, #tpu.memory_space<vmem>>, %arg5: memref<2x3x4xf32, #tpu.memory_space<vmem>>) attributes {dimension_semantics = [#tpu.dimension_semantics<parallel>, #tpu.dimension_semantics<arbitrary>], iteration_bounds = array<i64: 2, 1>, scalar_prefetch = 0 : i64, scratch_operands = 1 : i64, tpu.core_type = #tpu.core_type<tc>, window_params = [{transform_indices = @transform_0, window_bounds = array<i64: 1, 3, 4, 4>}, {transform_indices = @transform_1, window_bounds = array<i64: 1, 3, 4, 4>}, {transform_indices = @transform_2, window_bounds = array<i64: 1, 2, 3, 3>}]} {
    %c0 = arith.constant 0 : index
    %c0_0 = arith.constant 0 : index
    %c0_1 = arith.constant 0 : index
    %c0_2 = arith.constant 0 : index
    %0 = vector.load %arg2[%c0, %c0_0, %c0_1, %c0_2] : memref<1x3x4x4xf32, #tpu.memory_space<vmem>>, vector<1x3x4x4xf32>
    %1 = vector.shape_cast %0 : vector<1x3x4x4xf32> to vector<3x4x4xf32>
    %c0_3 = arith.constant 0 : index
    %c0_4 = arith.constant 0 : index
    %c0_5 = arith.constant 0 : index
    %c0_6 = arith.constant 0 : index
    %2 = vector.load %arg3[%c0_3, %c0_4, %c0_5, %c0_6] : memref<1x3x4x4xf32, #tpu.memory_space<vmem>>, vector<1x3x4x4xf32>
    %3 = vector.shape_cast %2 : vector<1x3x4x4xf32> to vector<3x4x4xf32>
    %c0_i32 = arith.constant 0 : i32
    %4 = arith.cmpi eq, %arg1, %c0_i32 : i32
    %5 = arith.extui %4 : i1 to i32
    %c0_i32_7 = arith.constant 0 : i32
    %6 = arith.cmpi ne, %5, %c0_i32_7 : i32
    scf.if %6 {
      %cst_38 = arith.constant 0.000000e+00 : f32
      %74 = vector.broadcast %cst_38 : f32 to vector<1x2x3x3xf32>
      %c0_39 = arith.constant 0 : index
      %c0_40 = arith.constant 0 : index
      %c0_41 = arith.constant 0 : index
      %c0_42 = arith.constant 0 : index
      %75 = vector.load %arg4[%c0_39, %c0_40, %c0_41, %c0_42] : memref<1x2x3x3xf32, #tpu.memory_space<vmem>>, vector<1x2x3x3xf32>
      tpu.vector_store %arg4[%c0_39, %c0_40, %c0_41, %c0_42], %74 {strides = array<i32>} : memref<1x2x3x3xf32, #tpu.memory_space<vmem>>, vector<1x2x3x3xf32>,
    } else {
    }
    %7 = vector.extract_strided_slice %1 {offsets = [0, 0, 1], sizes = [3, 4, 3], strides = [1, 1, 1]} : vector<3x4x4xf32> to vector<3x4x3xf32>
    %8 = vector.extract_strided_slice %1 {offsets = [0, 0, 0], sizes = [3, 4, 3], strides = [1, 1, 1]} : vector<3x4x4xf32> to vector<3x4x3xf32>
    %9 = arith.subf %7, %8 : vector<3x4x3xf32>
    %cst = arith.constant 5.000000e-01 : f32
    %10 = vector.broadcast %cst : f32 to vector<3x4x3xf32>
    %11 = arith.mulf %10, %9 : vector<3x4x3xf32>
    %12 = math.tanh %11 : vector<3x4x3xf32>
    %13 = arith.mulf %12, %12 : vector<3x4x3xf32>
    %14 = vector.extract_strided_slice %3 {offsets = [0, 0, 1], sizes = [3, 4, 3], strides = [1, 1, 1]} : vector<3x4x4xf32> to vector<3x4x3xf32>
    %15 = vector.extract_strided_slice %3 {offsets = [0, 0, 0], sizes = [3, 4, 3], strides = [1, 1, 1]} : vector<3x4x4xf32> to vector<3x4x3xf32>
    %16 = arith.subf %14, %15 : vector<3x4x3xf32>
    %cst_8 = arith.constant 5.000000e-01 : f32
    %17 = vector.broadcast %cst_8 : f32 to vector<3x4x3xf32>
    %18 = arith.mulf %17, %16 : vector<3x4x3xf32>
    %19 = math.tanh %18 : vector<3x4x3xf32>
    %20 = arith.mulf %19, %19 : vector<3x4x3xf32>
    %c0_9 = arith.constant 0 : index
    %c1 = arith.constant 1 : index
    %c0_10 = arith.constant 0 : index
    %c0_11 = arith.constant 0 : index
    %21 = vector.load %arg4[%c0_9, %c1, %c0_10, %c0_11] : memref<1x2x3x3xf32, #tpu.memory_space<vmem>>, vector<1x1x3x3xf32>
    %22 = vector.shape_cast %21 : vector<1x1x3x3xf32> to vector<3x3xf32>
    %23 = vector.shape_cast %20 : vector<3x4x3xf32> to vector<3x1x4x3xf32>
    %24 = vector.shape_cast %13 : vector<3x4x3xf32> to vector<1x3x4x3xf32>
    %25 = vector.broadcast %23 : vector<3x1x4x3xf32> to vector<3x3x4x3xf32>
    %26 = vector.broadcast %24 : vector<1x3x4x3xf32> to vector<3x3x4x3xf32>
    %27 = arith.mulf %25, %26 : vector<3x3x4x3xf32>
    %cst_12 = arith.constant dense<0.000000e+00> : vector<3x3x4xf32>
    %28 = vector.multi_reduction <add>, %27, %cst_12 [3] : vector<3x3x4x3xf32> to vector<3x3x4xf32>
    %cst_13 = arith.constant dense<0.000000e+00> : vector<3x3xf32>
    %29 = vector.multi_reduction <add>, %28, %cst_13 [2] : vector<3x3x4xf32> to vector<3x3xf32>
    %30 = arith.addf %22, %29 : vector<3x3xf32>
    %c0_14 = arith.constant 0 : index
    %c1_15 = arith.constant 1 : index
    %c0_16 = arith.constant 0 : index
    %c0_17 = arith.constant 0 : index
    %31 = vector.load %arg4[%c0_14, %c1_15, %c0_16, %c0_17] : memref<1x2x3x3xf32, #tpu.memory_space<vmem>>, vector<1x1x3x3xf32>
    %32 = vector.shape_cast %31 : vector<1x1x3x3xf32> to vector<3x3xf32>
    %33 = vector.shape_cast %30 : vector<3x3xf32> to vector<1x1x3x3xf32>
    tpu.vector_store %arg4[%c0_14, %c1_15, %c0_16, %c0_17], %33 {strides = array<i32>} : memref<1x2x3x3xf32, #tpu.memory_space<vmem>>, vector<1x1x3x3xf32>,
    %34 = vector.extract_strided_slice %1 {offsets = [0, 1, 0], sizes = [3, 3, 4], strides = [1, 1, 1]} : vector<3x4x4xf32> to vector<3x3x4xf32>
    %35 = vector.extract_strided_slice %1 {offsets = [0, 0, 0], sizes = [3, 3, 4], strides = [1, 1, 1]} : vector<3x4x4xf32> to vector<3x3x4xf32>
    %36 = arith.subf %34, %35 : vector<3x3x4xf32>
    %cst_18 = arith.constant 5.000000e-01 : f32
    %37 = vector.broadcast %cst_18 : f32 to vector<3x3x4xf32>
    %38 = arith.mulf %37, %36 : vector<3x3x4xf32>
    %39 = math.tanh %38 : vector<3x3x4xf32>
    %40 = arith.mulf %39, %39 : vector<3x3x4xf32>
    %41 = vector.extract_strided_slice %3 {offsets = [0, 1, 0], sizes = [3, 3, 4], strides = [1, 1, 1]} : vector<3x4x4xf32> to vector<3x3x4xf32>
    %42 = vector.extract_strided_slice %3 {offsets = [0, 0, 0], sizes = [3, 3, 4], strides = [1, 1, 1]} : vector<3x4x4xf32> to vector<3x3x4xf32>
    %43 = arith.subf %41, %42 : vector<3x3x4xf32>
    %cst_19 = arith.constant 5.000000e-01 : f32
    %44 = vector.broadcast %cst_19 : f32 to vector<3x3x4xf32>
    %45 = arith.mulf %44, %43 : vector<3x3x4xf32>
    %46 = math.tanh %45 : vector<3x3x4xf32>
    %47 = arith.mulf %46, %46 : vector<3x3x4xf32>
    %c0_20 = arith.constant 0 : index
    %c0_21 = arith.constant 0 : index
    %c0_22 = arith.constant 0 : index
    %c0_23 = arith.constant 0 : index
    %48 = vector.load %arg4[%c0_20, %c0_21, %c0_22, %c0_23] : memref<1x2x3x3xf32, #tpu.memory_space<vmem>>, vector<1x1x3x3xf32>
    %49 = vector.shape_cast %48 : vector<1x1x3x3xf32> to vector<3x3xf32>
    %50 = vector.shape_cast %47 : vector<3x3x4xf32> to vector<3x1x3x4xf32>
    %51 = vector.shape_cast %40 : vector<3x3x4xf32> to vector<1x3x3x4xf32>
    %52 = vector.broadcast %50 : vector<3x1x3x4xf32> to vector<3x3x3x4xf32>
    %53 = vector.broadcast %51 : vector<1x3x3x4xf32> to vector<3x3x3x4xf32>
    %54 = arith.mulf %52, %53 : vector<3x3x3x4xf32>
    %cst_24 = arith.constant dense<0.000000e+00> : vector<3x3x3xf32>
    %55 = vector.multi_reduction <add>, %54, %cst_24 [3] : vector<3x3x3x4xf32> to vector<3x3x3xf32>
    %cst_25 = arith.constant dense<0.000000e+00> : vector<3x3xf32>
    %56 = vector.multi_reduction <add>, %55, %cst_25 [2] : vector<3x3x3xf32> to vector<3x3xf32>
    %57 = arith.addf %49, %56 : vector<3x3xf32>
    %c0_26 = arith.constant 0 : index
    %c0_27 = arith.constant 0 : index
    %c0_28 = arith.constant 0 : index
    %c0_29 = arith.constant 0 : index
    %58 = vector.load %arg4[%c0_26, %c0_27, %c0_28, %c0_29] : memref<1x2x3x3xf32, #tpu.memory_space<vmem>>, vector<1x1x3x3xf32>
    %59 = vector.shape_cast %58 : vector<1x1x3x3xf32> to vector<3x3xf32>
    %60 = vector.shape_cast %57 : vector<3x3xf32> to vector<1x1x3x3xf32>
    tpu.vector_store %arg4[%c0_26, %c0_27, %c0_28, %c0_29], %60 {strides = array<i32>} : memref<1x2x3x3xf32, #tpu.memory_space<vmem>>, vector<1x1x3x3xf32>,
    %c0_i32_30 = arith.constant 0 : i32
    %61 = arith.cmpi sgt, %arg1, %c0_i32_30 : i32
    %62 = arith.extui %61 : i1 to i32
    %c0_i32_31 = arith.constant 0 : i32
    %63 = arith.cmpi ne, %62, %c0_i32_31 : i32
    scf.if %63 {
      %74 = vector.extract_strided_slice %1 {offsets = [0, 0, 0], sizes = [3, 1, 4], strides = [1, 1, 1]} : vector<3x4x4xf32> to vector<3x1x4xf32>
      %75 = vector.shape_cast %74 : vector<3x1x4xf32> to vector<3x4xf32>
      %c0_38 = arith.constant 0 : index
      %c0_39 = arith.constant 0 : index
      %c0_40 = arith.constant 0 : index
      %76 = vector.load %arg5[%c0_38, %c0_39, %c0_40] : memref<2x3x4xf32, #tpu.memory_space<vmem>>, vector<1x3x4xf32>
      %77 = vector.shape_cast %76 : vector<1x3x4xf32> to vector<3x4xf32>
      %78 = arith.subf %75, %77 : vector<3x4xf32>
      %cst_41 = arith.constant 5.000000e-01 : f32
      %79 = vector.broadcast %cst_41 : f32 to vector<3x4xf32>
      %80 = arith.mulf %79, %78 : vector<3x4xf32>
      %81 = math.tanh %80 : vector<3x4xf32>
      %82 = arith.mulf %81, %81 : vector<3x4xf32>
      %83 = vector.extract_strided_slice %3 {offsets = [0, 0, 0], sizes = [3, 1, 4], strides = [1, 1, 1]} : vector<3x4x4xf32> to vector<3x1x4xf32>
      %84 = vector.shape_cast %83 : vector<3x1x4xf32> to vector<3x4xf32>
      %c1_42 = arith.constant 1 : index
      %c0_43 = arith.constant 0 : index
      %c0_44 = arith.constant 0 : index
      %85 = vector.load %arg5[%c1_42, %c0_43, %c0_44] : memref<2x3x4xf32, #tpu.memory_space<vmem>>, vector<1x3x4xf32>
      %86 = vector.shape_cast %85 : vector<1x3x4xf32> to vector<3x4xf32>
      %87 = arith.subf %84, %86 : vector<3x4xf32>
      %cst_45 = arith.constant 5.000000e-01 : f32
      %88 = vector.broadcast %cst_45 : f32 to vector<3x4xf32>
      %89 = arith.mulf %88, %87 : vector<3x4xf32>
      %90 = math.tanh %89 : vector<3x4xf32>
      %91 = arith.mulf %90, %90 : vector<3x4xf32>
      %c0_46 = arith.constant 0 : index
      %c0_47 = arith.constant 0 : index
      %c0_48 = arith.constant 0 : index
      %c0_49 = arith.constant 0 : index
      %92 = vector.load %arg4[%c0_46, %c0_47, %c0_48, %c0_49] : memref<1x2x3x3xf32, #tpu.memory_space<vmem>>, vector<1x1x3x3xf32>
      %93 = vector.shape_cast %92 : vector<1x1x3x3xf32> to vector<3x3xf32>
      %94 = vector.shape_cast %91 : vector<3x4xf32> to vector<3x1x4xf32>
      %95 = vector.shape_cast %82 : vector<3x4xf32> to vector<1x3x4xf32>
      %96 = vector.broadcast %94 : vector<3x1x4xf32> to vector<3x3x4xf32>
      %97 = vector.broadcast %95 : vector<1x3x4xf32> to vector<3x3x4xf32>
      %98 = arith.mulf %96, %97 : vector<3x3x4xf32>
      %cst_50 = arith.constant dense<0.000000e+00> : vector<3x3xf32>
      %99 = vector.multi_reduction <add>, %98, %cst_50 [2] : vector<3x3x4xf32> to vector<3x3xf32>
      %100 = arith.addf %93, %99 : vector<3x3xf32>
      %c0_51 = arith.constant 0 : index
      %c0_52 = arith.constant 0 : index
      %c0_53 = arith.constant 0 : index
      %c0_54 = arith.constant 0 : index
      %101 = vector.load %arg4[%c0_51, %c0_52, %c0_53, %c0_54] : memref<1x2x3x3xf32, #tpu.memory_space<vmem>>, vector<1x1x3x3xf32>
      %102 = vector.shape_cast %101 : vector<1x1x3x3xf32> to vector<3x3xf32>
      %103 = vector.shape_cast %100 : vector<3x3xf32> to vector<1x1x3x3xf32>
      tpu.vector_store %arg4[%c0_51, %c0_52, %c0_53, %c0_54], %103 {strides = array<i32>} : memref<1x2x3x3xf32, #tpu.memory_space<vmem>>, vector<1x1x3x3xf32>,
    } else {
    }
    %64 = vector.extract_strided_slice %1 {offsets = [0, 3, 0], sizes = [3, 1, 4], strides = [1, 1, 1]} : vector<3x4x4xf32> to vector<3x1x4xf32>
    %65 = vector.shape_cast %64 : vector<3x1x4xf32> to vector<3x4xf32>
    %c0_32 = arith.constant 0 : index
    %c0_33 = arith.constant 0 : index
    %c0_34 = arith.constant 0 : index
    %66 = vector.load %arg5[%c0_32, %c0_33, %c0_34] : memref<2x3x4xf32, #tpu.memory_space<vmem>>, vector<1x3x4xf32>
    %67 = vector.shape_cast %66 : vector<1x3x4xf32> to vector<3x4xf32>
    %68 = vector.shape_cast %65 : vector<3x4xf32> to vector<1x3x4xf32>
    tpu.vector_store %arg5[%c0_32, %c0_33, %c0_34], %68 {strides = array<i32>} : memref<2x3x4xf32, #tpu.memory_space<vmem>>, vector<1x3x4xf32>,
    %69 = vector.extract_strided_slice %3 {offsets = [0, 3, 0], sizes = [3, 1, 4], strides = [1, 1, 1]} : vector<3x4x4xf32> to vector<3x1x4xf32>
    %70 = vector.shape_cast %69 : vector<3x1x4xf32> to vector<3x4xf32>
    %c1_35 = arith.constant 1 : index
    %c0_36 = arith.constant 0 : index
    %c0_37 = arith.constant 0 : index
    %71 = vector.load %arg5[%c1_35, %c0_36, %c0_37] : memref<2x3x4xf32, #tpu.memory_space<vmem>>, vector<1x3x4xf32>
    %72 = vector.shape_cast %71 : vector<1x3x4xf32> to vector<3x4xf32>
    %73 = vector.shape_cast %70 : vector<3x4xf32> to vector<1x3x4xf32>
    tpu.vector_store %arg5[%c1_35, %c0_36, %c0_37], %73 {strides = array<i32>} : memref<2x3x4xf32, #tpu.memory_space<vmem>>, vector<1x3x4xf32>,
    return
  }
  func.func @transform_0(%arg0: i32, %arg1: i32) -> (i32, i32, i32, i32) {
    %c0_i32 = arith.constant 0 : i32
    %c0_i32_0 = arith.constant 0 : i32
    %c0_i32_1 = arith.constant 0 : i32
    return %arg0, %c0_i32, %arg1, %c0_i32_0 : i32, i32, i32, i32
  }
  func.func @transform_1(%arg0: i32, %arg1: i32) -> (i32, i32, i32, i32) {
    %c0_i32 = arith.constant 0 : i32
    %c0_i32_0 = arith.constant 0 : i32
    %c0_i32_1 = arith.constant 0 : i32
    return %arg0, %c0_i32, %arg1, %c0_i32_0 : i32, i32, i32, i32
  }
  func.func @transform_2(%arg0: i32, %arg1: i32) -> (i32, i32, i32, i32) {
    %c0_i32 = arith.constant 0 : i32
    %c0_i32_0 = arith.constant 0 : i32
    %c0_i32_1 = arith.constant 0 : i32
    %c0_i32_2 = arith.constant 0 : i32
    return %arg0, %c0_i32, %c0_i32_0, %c0_i32_1 : i32, i32, i32, i32
  }
}

</mosaic_0001>

<bundles_post_ra>
// kernel: _exclusion_loss_impl.4
= control target key start
LH: loop header
LB: loop body
LE: loop exit
PB: predicated region body
PF: predicated region fallthrough
CT: control target
= control target key end

     0   :  { %s798_s9 = smov 0   ;;  %s800_s10 = smov 0   ;;  %s976_s0 = inlined_call_operand.vmem [shape: f32[2,3,8,8], index: 0, kind: input, shape index: {}]   ;;  %s977_s1 = inlined_call_operand.vmem [shape: f32[2,3,8,8], index: 1, kind: input, shape index: {}]   ;;  %s978_s2 = inlined_call_operand.vmem [shape: f32[2,2,3,3], index: 2, kind: output, shape index: {}]  }
   0x1   :  { %s802_s11 = smov 0  }
   0x2 LB: > { %s24_s12 = sadd.s32 1, %s774_s10  ;;  %p694_p0 = scmp.ge.s32.totalorder %s778_s11, 1  ;;  %s778_s11 = sphi %s802_s11, %s12_s11   ;;  %s774_s10 = sphi %s800_s10, %s980_s10   ;;  %s770_s9 = sphi %s798_s9, %s979_s9  }
   0x3   : > { %p26_p1 = scmp.ge.s32.totalorder %s24_s12, 2  ;;  %p144_p2 = scmp.lt.s32.totalorder %s778_s11, 3 }
   0x5   : > { %s982_s12 = smov (%p26_p1, %s24_s12), 0  ;;  %p145_p3 = pnand %p694_p0, %p144_p2 }
   0x6   : > { %p177_p4 = scmp.lt.s32.totalorder (!%p145_p3), %s770_s9, 1  ;;  %s780_s20 = smov (!%p145_p3), 1  }
   0x7   : > { %148 = sbr.rel (%p145_p3) target bundleno = 597 (0x255), region = 28  ;;  %s781_s21 = smov (!%p145_p3), 127  }
   0xc   : > { %s984_s9 = smov (!%p177_p4, %s770_s9), 1  ;;  %vm354_vm0 = vcmask 1041409   ;;  %vm433_vm1 = vcmask 64513   ;;  %vm356_vm2 = vcmask 1042434   ;;  %vm306_vm3 = vcmask 56320  }
   0xd   : > { %s704_s13 = smul.u32 24, %s984_s9  ;;  %vm489_vm4 = vcmask 51200   ;;  %vm365_vm5 = vcmask 59392   ;;  %s703_s22 = sshll.u32 %s984_s9, 3  ;;  %vm208_vm6 = vcmask 18432  }
   0xe   : > { %s197_s25 = scalar_lea.vmem %s978_s2, %s703_s22 }
   0xf   : > { %s192_s16 = scalar_lea.vmem %s977_s1, %s704_s13  ;;  %s184_s19 = scalar_lea.vmem %s976_s0, %s704_s13 }
  0x10   : > { %v825_v0 = vld [vmem:[%s192_s16] sm:$0xff]  ;;  %v831_v2 = vld [vmem:[%s184_s19 + $0x8] sm:$0xff]  ;;  %v833_v3 = vld [vmem:[%s184_s19 + $0x10] sm:$0xff] }
  0x11   : > { %v827_v1 = vld [vmem:[%s184_s19] sm:$0xff]  ;;  %238 = vrot.lane.b32.xlu1 %v825_v0, %s780_s20  ;;  %v835_v4 = vld [vmem:[%s192_s16 + $0x8] sm:$0xff]  ;;  %v388_v5 = vrot.slane %v831_v2, 7  ;;  %218 = vrot.lane.b32.xlu2 %v833_v3, %s780_s20  ;;  %v405_v9 = vrot.slane %v825_v0, 7  ;;  %v389_v16 = vrot.slane %v833_v3, 7 }
  0x12   : > { %214 = vrot.lane.b32.xlu0 %v827_v1, %s780_s20  ;;  %v839_v6 = vld [vmem:[%s192_s16 + $0x10] sm:$0xff]  ;;  %v406_v7 = vrot.slane %v835_v4, 7  ;;  %v387_v8 = vrot.slane %v827_v1, 7 }
  0x13   : > { %v411_v12 = vsub.f32 %v825_v0, %v405_v9  ;;  %v395_v17 = vsub.f32 %v833_v3, %v389_v16  ;;  %v394_v32 = vsub.f32 %v831_v2, %v388_v5 }
  0x14   : > { %v412_v10 = vsub.f32 %v835_v4, %v406_v7  ;;  %v393_v11 = vsub.f32 %v827_v1, %v387_v8 }
  0x15   : > { %v414_v15 = vmul.f32 0.5, %v411_v12  ;;  %v398_v19 = vmul.f32 0.5, %v395_v17  ;;  %v397_v34 = vmul.f32 0.5, %v394_v32  ;;  %v407_v17 = vrot.slane %v839_v6, 7 }
  0x16   : > { %v415_v13 = vmul.f32 0.5, %v412_v10  ;;  %v396_v14 = vmul.f32 0.5, %v393_v11 }
  0x18   : > { %732 = vtanh.f32 %v415_v13 }
  0x19   : > { %240 = vrot.lane.b32.xlu1 %v835_v4, %s780_s20  ;;  %242 = vrot.lane.b32.xlu2 %v839_v6, %s780_s20  ;;  %734 = vtanh.f32 %v396_v14 }
  0x1a   : > { %216 = vrot.lane.b32.xlu0 %v831_v2, %s780_s20  ;;  %736 = vtanh.f32 %v414_v15 }
  0x1b   : > { %738 = vtanh.f32 %v398_v19 }
  0x1c   : > { %740 = vtanh.f32 %v397_v34 }
  0x1e   : > { %v733_v18 = vpop.eup %732 }
  0x1f   : > { %v735_v20 = vpop.eup %734  ;;  %v854_v23 = vmul.f32 %v733_v18, %v733_v18  ;;  %v413_v18 = vsub.f32 %v839_v6, %v407_v17 }
  0x20   : > { %v737_v21 = vpop.eup %736  ;;  %v852_v22 = vmul.f32 %v735_v20, %v735_v20 }
  0x21   : > { %v420_v24 = vmul.f32 %v737_v21, %v737_v21  ;;  %v739_v27 = vpop.eup %738  ;;  %v416_v19 = vmul.f32 0.5, %v413_v18 }
  0x22   : > { %v427_v25 = vmul.f32 %v854_v23, %v852_v22  ;;  %v861_v30 = vmul.f32 %v739_v27, %v739_v27  ;;  %v741_v35 = vpop.eup %740 }
  0x23   : > { %v424_v26 = vmul.f32 %v420_v24, %v852_v22  ;;  %v866_v36 = vmul.f32 %v741_v35, %v741_v35 }
  0x24   : > { %v443_v28 = vsel %vm433_vm1, %v427_v25, 0.0  ;;  %v426_v31 = vmul.f32 %v420_v24, %v861_v30  ;;  %v429_v25 = vmul.f32 %v854_v23, %v861_v30 }
  0x25   : > { %v434_v29 = vsel %vm433_vm1, %v424_v26, 0.0  ;;  %v428_v37 = vmul.f32 %v854_v23, %v866_v36  ;;  %v425_v38 = vmul.f32 %v420_v24, %v866_v36  ;;  %v343_v26 = vlaneseq }
  0x26   : > { %v440_v33 = vsel %vm433_vm1, %v426_v31, 0.0 }
  0x27   : > { %v446_v39 = vsel %vm433_vm1, %v428_v37, 0.0  ;;  %v437_v40 = vsel %vm433_vm1, %v425_v38, 0.0  ;;  %v894_v31 = vand.u32 127, %v343_v26 }
  0x42   : > { %444 = vadd.xlane.f32.xlu2 %v443_v28  ;;  %v449_v28 = vsel %vm433_vm1, %v429_v25, 0.0 }
  0x43   : > { %438 = vadd.xlane.f32.xlu1 %v437_v40 }
  0x44   : > { %435 = vadd.xlane.f32.xlu0 %v434_v29 }
  0x4a   : > { %441 = vadd.xlane.f32.xlu2 %v440_v33 }
  0x4c   : > { %447 = vadd.xlane.f32.xlu0 %v446_v39 }
  0x6b   : > { %v219_v41 = vpop.permute.xlu2 %218 }
  0x6c   : > { %v225_v53 = vsub.f32 %v833_v3, %v219_v41 }
  0x6e   : > { %v228_v61 = vmul.f32 0.5, %v225_v53 }
  0x73   : > { %v243_v45 = vpop.permute.xlu2 %242 }
  0x74   : > { %v249_v49 = vsub.f32 %v839_v6, %v243_v45  ;;  %v897_v6 = vadd.s32 1, %v894_v31 }
  0x76   : > { %v252_v50 = vmul.f32 0.5, %v249_v49 }
  0x83   : > { %v239_v42 = vpop.permute.xlu1 %238 }
  0x84   : > { %v215_v43 = vpop.permute.xlu0 %214  ;;  %v247_v44 = vsub.f32 %v825_v0, %v239_v42 }
  0x85   : > { %v223_v46 = vsub.f32 %v827_v1, %v215_v43 }
  0x86   : > { %v250_v47 = vmul.f32 0.5, %v247_v44 }
  0x87   : > { %v226_v48 = vmul.f32 0.5, %v223_v46 }
  0x88   : > { %742 = vtanh.f32 %v250_v47 }
  0x89   : > { %744 = vtanh.f32 %v226_v48 }
  0x8a   : > { %746 = vtanh.f32 %v252_v50 }
  0x8b   : > { %v241_v51 = vpop.permute.xlu1 %240 }
  0x8c   : > { %v217_v52 = vpop.permute.xlu0 %216  ;;  %v248_v54 = vsub.f32 %v835_v4, %v241_v51 }
  0x8d   : > { %v224_v55 = vsub.f32 %v831_v2, %v217_v52 }
  0x8e   : > { %v743_v56 = vpop.eup %742  ;;  %v251_v57 = vmul.f32 0.5, %v248_v54 }
  0x8f   : > { %v227_v58 = vmul.f32 0.5, %v224_v55  ;;  %v745_v59 = vpop.eup %744  ;;  %v256_v60 = vmul.f32 %v743_v56, %v743_v56 }
  0x90   : > { %v232_v62 = vmul.f32 %v745_v59, %v745_v59  ;;  %748 = vtanh.f32 %v251_v57  ;;  %v747_v0 = vpop.eup %746 }
  0x91   : > { %750 = vtanh.f32 %v227_v58  ;;  %v258_v2 = vmul.f32 %v747_v0, %v747_v0 }
  0x92   : > { %v261_v63 = vmul.f32 %v256_v60, %v232_v62  ;;  %752 = vtanh.f32 %v228_v61 }
  0x93   : > { %v267_v15 = vmul.f32 %v258_v2, %v232_v62  ;;  %754 = vtanh.f32 %v416_v19 }
  0x94   : > { %279 = vrot.lane.b32.xlu0 %v261_v63, %s781_s21 }
  0x96   : > { %v749_v1 = vpop.eup %748 }
  0x97   : > { %v751_v3 = vpop.eup %750  ;;  %v257_v4 = vmul.f32 %v749_v1, %v749_v1 }
  0x98   : > { %v233_v5 = vmul.f32 %v751_v3, %v751_v3  ;;  %v753_v8 = vpop.eup %752 }
  0x99   : > { %v264_v7 = vmul.f32 %v257_v4, %v232_v62  ;;  %v234_v12 = vmul.f32 %v753_v8, %v753_v8  ;;  %v755_v20 = vpop.eup %754 }
  0x9a   : > { %v262_v9 = vmul.f32 %v256_v60, %v233_v5  ;;  %v265_v10 = vmul.f32 %v257_v4, %v233_v5  ;;  %v268_v11 = vmul.f32 %v258_v2, %v233_v5  ;;  %v422_v21 = vmul.f32 %v755_v20, %v755_v20 }
  0x9b   : > { %285 = vrot.lane.b32.xlu2 %v264_v7, %s781_s21  ;;  %v266_v13 = vmul.f32 %v257_v4, %v234_v12  ;;  %v263_v14 = vmul.f32 %v256_v60, %v234_v12  ;;  %v269_v16 = vmul.f32 %v258_v2, %v234_v12 }
  0x9c   : > { %281 = vrot.lane.b32.xlu1 %v262_v9, %s781_s21  ;;  %287 = vrot.lane.b32.xlu0 %v265_v10, %s781_s21  ;;  %v430_v24 = vmul.f32 %v422_v21, %v852_v22  ;;  %v431_v57 = vmul.f32 %v422_v21, %v866_v36  ;;  %v432_v0 = vmul.f32 %v422_v21, %v861_v30 }
  0x9e   : > { %v452_v27 = vsel %vm433_vm1, %v430_v24, 0.0  ;;  %v455_v59 = vsel %vm433_vm1, %v431_v57, 0.0  ;;  %v458_v1 = vsel %vm433_vm1, %v432_v0, 0.0 }
  0xa3   : > { %289 = vrot.lane.b32.xlu2 %v266_v13, %s781_s21 }
  0xa4   : > { %283 = vrot.lane.b32.xlu1 %v263_v14, %s781_s21  ;;  %291 = vrot.lane.b32.xlu0 %v267_v15, %s781_s21 }
  0xab   : > { %295 = vrot.lane.b32.xlu2 %v269_v16, %s781_s21 }
  0xb5   : > { %v445_v29 = vpop.xlane.xlu2 %444 }
  0xb6   : > { %v439_v32 = vpop.xlane.xlu1 %438  ;;  %v474_v49 = vperm.slane %v445_v29, %v897_v6 }
  0xb7   : > { %v472_v22 = vperm.slane %v439_v32, %v897_v6  ;;  %v436_v34 = vpop.xlane.xlu0 %435 }
  0xb8   : > { %v471_v35 = vperm.slane %v436_v34, %v897_v6 }
  0xba   : > { %v480_v37 = vsel %vm354_vm0, %v472_v22, %v471_v35 }
  0xbd   : > { %v442_v33 = vpop.xlane.xlu2 %441 }
  0xbe   : > { %v473_v23 = vperm.slane %v442_v33, %v897_v6 }
  0xbf   : > { %v448_v41 = vpop.xlane.xlu0 %447 }
  0xc0   : > { %v481_v38 = vsel %vm356_vm2, %v473_v23, %v480_v37  ;;  %v475_v50 = vperm.slane %v448_v41, %v897_v6 }
  0xc1   : > { %v490_v36 = vsel %vm489_vm4, %v481_v38, 0.0 }
  0xc2   : > { %v482_v56 = vsel %vm354_vm0, %v475_v50, %v474_v49 }
  0xce   : > { %453 = vadd.xlane.f32.xlu1 %v452_v27  ;;  %450 = vadd.xlane.f32.xlu0 %v449_v28 }
  0xe7   : > { %293 = vrot.lane.b32.xlu1 %v268_v11, %s781_s21 }
  0xf5   : > { %v286_v39 = vpop.permute.xlu2 %285 }
  0xf6   : > { %v316_v40 = vsel %vm306_vm3, %v286_v39, 0.0 }
  0xf7   : > { %317 = vadd.xlane.f32.xlu2 %v316_v40 }
  0xfd   : > { %v290_v48 = vpop.permute.xlu2 %289 }
  0xfe   : > { %v322_v53 = vsel %vm306_vm3, %v290_v48, 0.0 }
 0x105   : > { %v296_v58 = vpop.permute.xlu2 %295 }
 0x106   : > { %v280_v42 = vpop.permute.xlu0 %279  ;;  %v331_v60 = vsel %vm306_vm3, %v296_v58, 0.0 }
 0x107   : > { %v307_v43 = vsel %vm306_vm3, %v280_v42, 0.0 }
 0x108   : > { %308 = vadd.xlane.f32.xlu0 %v307_v43 }
 0x10e   : > { %v282_v44 = vpop.permute.xlu1 %281  ;;  %v288_v45 = vpop.permute.xlu0 %287 }
 0x10f   : > { %v319_v46 = vsel %vm306_vm3, %v288_v45, 0.0  ;;  %v310_v47 = vsel %vm306_vm3, %v282_v44, 0.0  ;;  %v782_v44 = vmov 0.0  }
 0x110   : > { %320 = vadd.xlane.f32.xlu2 %v319_v46  ;;  %210 = vst.msk [vmem:[%s197_s25 + $0x4] sm:$0x7] %vm208_vm6, %v782_v44 }
 0x111   : > { %311 = vadd.xlane.f32.xlu1 %v310_v47  ;;  %209 = vst.msk [vmem:[%s197_s25] sm:$0x7] %vm208_vm6, %v782_v44 }
 0x116   : > { %v284_v51 = vpop.permute.xlu1 %283  ;;  %v292_v52 = vpop.permute.xlu0 %291 }
 0x117   : > { %v325_v54 = vsel %vm306_vm3, %v292_v52, 0.0  ;;  %v313_v55 = vsel %vm306_vm3, %v284_v51, 0.0  ;;  %v699_v50 = vld [vmem:[%s197_s25 + $0x4] sm:$0x7] }
 0x118   : > { %323 = vadd.xlane.f32.xlu2 %v322_v53  ;;  %326 = vadd.xlane.f32.xlu0 %v325_v54 }
 0x119   : > { %314 = vadd.xlane.f32.xlu1 %v313_v55 }
 0x120   : > { %456 = vadd.xlane.f32.xlu2 %v455_v59  ;;  %332 = vadd.xlane.f32.xlu0 %v331_v60  ;;  %v423_v59 = vld [vmem:[%s197_s25] sm:$0x7] }
 0x141   : > { %v454_v61 = vpop.xlane.xlu1 %453  ;;  %v451_v4 = vpop.xlane.xlu0 %450 }
 0x142   : > { %v476_v21 = vperm.slane %v451_v4, %v897_v6  ;;  %v477_v38 = vperm.slane %v454_v61, %v897_v6 }
 0x144   : > { %v483_v24 = vsel %vm356_vm2, %v476_v21, %v482_v56 }
 0x145   : > { %v493_v25 = vsel %vm489_vm4, %v483_v24, 0.0 }
 0x159   : > { %v294_v62 = vpop.permute.xlu1 %293 }
 0x15a   : > { %v328_v63 = vsel %vm306_vm3, %v294_v62, 0.0 }
 0x15b   : > { %329 = vadd.xlane.f32.xlu1 %v328_v63 }
 0x163   : > { %459 = vadd.xlane.f32.xlu1 %v458_v1 }
 0x16a   : > { %v318_v3 = vpop.xlane.xlu2 %317 }
 0x16b   : > { %491 = vadd.xlane.f32.xlu1 %v490_v36  ;;  %v348_v10 = vperm.slane %v318_v3, %v894_v31 }
 0x17b   : > { %v309_v7 = vpop.xlane.xlu0 %308 }
 0x17c   : > { %v345_v30 = vperm.slane %v309_v7, %v894_v31 }
 0x183   : > { %v321_v2 = vpop.xlane.xlu2 %320 }
 0x184   : > { %v312_v5 = vpop.xlane.xlu1 %311  ;;  %v349_v8 = vperm.slane %v321_v2, %v894_v31 }
 0x185   : > { %v346_v9 = vperm.slane %v312_v5, %v894_v31 }
 0x186   : > { %v358_v15 = vsel %vm354_vm0, %v349_v8, %v348_v10 }
 0x187   : > { %v355_v17 = vsel %vm354_vm0, %v346_v9, %v345_v30 }
 0x18b   : > { %v324_v11 = vpop.xlane.xlu2 %323  ;;  %v327_v26 = vpop.xlane.xlu0 %326 }
 0x18c   : > { %v350_v12 = vperm.slane %v324_v11, %v894_v31  ;;  %v315_v13 = vpop.xlane.xlu1 %314  ;;  %v351_v29 = vperm.slane %v327_v26, %v894_v31 }
 0x18d   : > { %v347_v14 = vperm.slane %v315_v13, %v894_v31 }
 0x18e   : > { %v359_v16 = vsel %vm356_vm2, %v350_v12, %v358_v15 }
 0x18f   : > { %v369_v18 = vsel %vm365_vm5, %v359_v16, 0.0  ;;  %v357_v19 = vsel %vm356_vm2, %v347_v14, %v355_v17 }
 0x190   : > { %370 = vadd.xlane.f32.xlu0 %v369_v18  ;;  %v366_v20 = vsel %vm365_vm5, %v357_v19, 0.0 }
 0x191   : > { %367 = vadd.xlane.f32.xlu2 %v366_v20 }
 0x193   : > { %v333_v27 = vpop.xlane.xlu0 %332  ;;  %v457_v22 = vpop.xlane.xlu2 %456 }
 0x194   : > { %v353_v33 = vperm.slane %v333_v27, %v894_v31  ;;  %v478_v37 = vperm.slane %v457_v22, %v897_v6 }
 0x196   : > { %v484_v41 = vsel %vm354_vm0, %v478_v37, %v477_v38 }
 0x199   : > { %494 = vadd.xlane.f32.xlu2 %v493_v25 }
 0x1ce   : > { %v330_v28 = vpop.xlane.xlu1 %329 }
 0x1cf   : > { %v352_v32 = vperm.slane %v330_v28, %v894_v31 }
 0x1d1   : > { %v360_v34 = vsel %vm354_vm0, %v352_v32, %v351_v29 }
 0x1d2   : > { %v361_v23 = vsel %vm356_vm2, %v353_v33, %v360_v34 }
 0x1d3   : > { %v372_v35 = vsel %vm365_vm5, %v361_v23, 0.0 }
 0x1d4   : > { %373 = vadd.xlane.f32.xlu0 %v372_v35 }
 0x1d6   : > { %v460_v39 = vpop.xlane.xlu1 %459 }
 0x1d7   : > { %v479_v40 = vperm.slane %v460_v39, %v897_v6 }
 0x1d9   : > { %v485_v42 = vsel %vm356_vm2, %v479_v40, %v484_v41 }
 0x1da   : > { %v496_v43 = vsel %vm489_vm4, %v485_v42, 0.0 }
 0x1db   : > { %497 = vadd.xlane.f32.xlu1 %v496_v43 }
 0x1de   : > { %v492_v48 = vpop.xlane.xlu1 %491 }
 0x1df   : > { %v502_v57 = vperm.slane %v492_v48, %v894_v31 }
 0x203   : > { %v371_v45 = vpop.xlane.xlu0 %370 }
 0x204   : > { %v368_v6 = vpop.xlane.xlu2 %367  ;;  %v379_v46 = vperm.slane %v371_v45, %v894_v31 }
 0x205   : > { %v378_v47 = vperm.slane %v368_v6, %v894_v31 }
 0x207   : > { %v381_v52 = vsel %vm354_vm0, %v379_v46, %v378_v47 }
 0x20c   : > { %v495_v53 = vpop.xlane.xlu2 %494 }
 0x20d   : > { %v503_v56 = vperm.slane %v495_v53, %v894_v31 }
 0x20f   : > { %v505_v61 = vsel %vm354_vm0, %v503_v56, %v502_v57 }
 0x247   : > { %v374_v49 = vpop.xlane.xlu0 %373 }
 0x248   : > { %v380_v51 = vperm.slane %v374_v49, %v894_v31 }
 0x24a   : > { %v382_v54 = vsel %vm356_vm2, %v380_v51, %v381_v52 }
 0x24b   : > { %v384_v55 = vadd.f32 %v699_v50, %v382_v54 }
 0x24d   : > { %700 = vst.msk [vmem:[%s197_s25 + $0x4] sm:$0x7] %vm208_vm6, %v384_v55 }
 0x24e   : > { %v498_v58 = vpop.xlane.xlu1 %497 }
 0x24f   : > { %v504_v60 = vperm.slane %v498_v58, %v894_v31 }
 0x251   : > { %v506_v62 = vsel %vm356_vm2, %v504_v60, %v505_v61 }
 0x252   : > { %v508_v63 = vadd.f32 %v506_v62, %v423_v59 }
 0x254   : > { %509 = vst.msk [vmem:[%s197_s25] sm:$0x7] %vm208_vm6, %v508_v63 }
 0x255 PF: > { %s12_s11 = sadd.s32 1, %s778_s11   ;;  %s979_s9 = smov %s774_s10 }
 0x256   : > { %p9_p5 = scmp.ge.s32.totalorder %s12_s11, 4   ;;  %s980_s10 = smov %s982_s12 }
 0x258   :  { %11 = sbr.rel (!%p9_p5) target bundleno = 2 (0x2), region = 72 }

// kernel: _exclusion_loss_impl.3
= control target key start
LH: loop header
LB: loop body
LE: loop exit
PB: predicated region body
PF: predicated region fallthrough
CT: control target
= control target key end

     0   :  { %s1096_s9 = smov 0   ;;  %s1098_s10 = smov 0   ;;  %s1398_s0 = inlined_call_operand.vmem [shape: f32[2,3,16,16], index: 0, kind: input, shape index: {}]   ;;  %s1399_s1 = inlined_call_operand.vmem [shape: f32[2,3,16,16], index: 1, kind: input, shape index: {}]   ;;  %s1400_s2 = inlined_call_operand.vmem [shape: f32[2,2,3,3], index: 2, kind: output, shape index: {}]  }
   0x1   :  { %s1100_s11 = smov 0  }
   0x2 LB: > { %s24_s12 = sadd.s32 1, %s1072_s10  ;;  %p968_p0 = scmp.ge.s32.totalorder %s1076_s11, 1  ;;  %s1076_s11 = sphi %s1100_s11, %s12_s11   ;;  %s1072_s10 = sphi %s1098_s10, %s1402_s10   ;;  %s1068_s9 = sphi %s1096_s9, %s1401_s9  }
   0x3   : > { %p26_p1 = scmp.ge.s32.totalorder %s24_s12, 2  ;;  %p148_p2 = scmp.lt.s32.totalorder %s1076_s11, 3 }
   0x5   : > { %s1404_s12 = smov (%p26_p1, %s24_s12), 0  ;;  %p149_p3 = pnand %p968_p0, %p148_p2 }
   0x6   : > { %p184_p4 = scmp.lt.s32.totalorder (!%p149_p3), %s1068_s9, 1  ;;  %s1078_s20 = smov (!%p149_p3), 1  }
   0x7   : > { %152 = sbr.rel (%p149_p3) target bundleno = 580 (0x244), region = 28  ;;  %s1079_s21 = smov (!%p149_p3), 127  }
   0xc   : > { %s1406_s9 = smov (!%p184_p4, %s1068_s9), 1  ;;  %vm519_vm0 = vcmask 1041409   ;;  %vm552_vm1 = vcmask 1040384   ;;  %vm650_vm2 = vcmask 130049   ;;  %vm654_vm3 = vcmask 130048  }
   0xd   : > { %s978_s13 = smul.u32 48, %s1406_s9  ;;  %vm728_vm4 = vcmask 121912   ;;  %vm521_vm5 = vcmask 1042434   ;;  %vm415_vm6 = vcmask 121856   ;;  %vm763_vm7 = vcmask 116736   ;;  %s977_s22 = sshll.u32 %s1406_s9, 3 }
   0xe   : > { %vm493_vm8 = vcmask 130112   ;;  %vm530_vm9 = vcmask 124928   ;;  %s207_s25 = scalar_lea.vmem %s1400_s2, %s977_s22  ;;  %vm224_vm10 = vcmask 18432  }
   0xf   : > { %s191_s16 = scalar_lea.vmem %s1398_s0, %s978_s13  ;;  %s201_s19 = scalar_lea.vmem %s1399_s1, %s978_s13 }
  0x10   : > { %v1120_v0 = vld [vmem:[%s191_s16 + $0x20] sm:$0xff]  ;;  %v1122_v1 = vld [vmem:[%s191_s16 + $0x10] sm:$0xff]  ;;  %v1131_v3 = vld [vmem:[%s191_s16 + $0x28] sm:$0xff] }
  0x11   : > { %v1124_v2 = vld [vmem:[%s191_s16] sm:$0xff]  ;;  %241 = vrot.lane.b32.xlu2 %v1120_v0, %s1078_s20  ;;  %237 = vrot.lane.b32.xlu1 %v1122_v1, %s1078_s20  ;;  %v1133_v4 = vld [vmem:[%s191_s16 + $0x18] sm:$0xff]  ;;  %v556_v18 = vrot.slane %v1122_v1, 7  ;;  %v559_v43 = vrot.slane %v1120_v0, 7  ;;  %v560_v48 = vrot.slane %v1131_v3, 7 }
  0x12   : > { %233 = vrot.lane.b32.xlu0 %v1124_v2, %s1078_s20  ;;  %v557_v5 = vrot.slane %v1133_v4, 7  ;;  %v1137_v6 = vld [vmem:[%s191_s16 + $0x8] sm:$0xff]  ;;  %v1143_v9 = vld [vmem:[%s201_s19 + $0x18] sm:$0xff]  ;;  %v1149_v11 = vld [vmem:[%s201_s19 + $0x10] sm:$0xff]  ;;  %v553_v14 = vrot.slane %v1124_v2, 7 }
  0x13   : > { %v1139_v7 = vld [vmem:[%s201_s19 + $0x8] sm:$0xff]  ;;  %v596_v10 = vrot.slane %v1143_v9, 7  ;;  %v1151_v12 = vld [vmem:[%s201_s19] sm:$0xff]  ;;  %v554_v15 = vrot.slane %v1137_v6, 7  ;;  %v570_v19 = vsub.f32 %v1122_v1, %v556_v18  ;;  %v595_v31 = vrot.slane %v1149_v11, 7 }
  0x14   : > { %v1141_v8 = vld [vmem:[%s201_s19 + $0x28] sm:$0xff]  ;;  %v1156_v13 = vld [vmem:[%s201_s19 + $0x20] sm:$0xff]  ;;  %v593_v16 = vrot.slane %v1139_v7, 7  ;;  %v592_v17 = vrot.slane %v1151_v12, 7  ;;  %v568_v21 = vsub.f32 %v1124_v2, %v553_v14  ;;  %v558_v29 = vsel %vm552_vm1, %v556_v18, %v557_v5 }
  0x15   : > { %v555_v20 = vsel %vm552_vm1, %v553_v14, %v554_v15  ;;  %v576_v25 = vmul.f32 0.5, %v570_v19  ;;  %v571_v33 = vsub.f32 %v1133_v4, %v558_v29  ;;  %v597_v34 = vsel %vm552_vm1, %v595_v31, %v596_v10 }
  0x16   : > { %v594_v22 = vsel %vm552_vm1, %v592_v17, %v593_v16  ;;  %v607_v23 = vsub.f32 %v1151_v12, %v592_v17  ;;  %v569_v24 = vsub.f32 %v1137_v6, %v555_v20  ;;  %v574_v27 = vmul.f32 0.5, %v568_v21 }
  0x17   : > { %v608_v26 = vsub.f32 %v1139_v7, %v594_v22  ;;  %1006 = vtanh.f32 %v576_v25  ;;  %v609_v35 = vsub.f32 %v1149_v11, %v595_v31  ;;  %v610_v36 = vsub.f32 %v1143_v9, %v597_v34 }
  0x18   : > { %v613_v28 = vmul.f32 0.5, %v607_v23  ;;  %v575_v30 = vmul.f32 0.5, %v569_v24  ;;  %1008 = vtanh.f32 %v574_v27  ;;  %v577_v38 = vmul.f32 0.5, %v571_v33 }
  0x19   : > { %243 = vrot.lane.b32.xlu2 %v1131_v3, %s1078_s20  ;;  %239 = vrot.lane.b32.xlu1 %v1133_v4, %s1078_s20  ;;  %v614_v32 = vmul.f32 0.5, %v608_v26  ;;  %v615_v41 = vmul.f32 0.5, %v609_v35  ;;  %v616_v44 = vmul.f32 0.5, %v610_v36  ;;  %v572_v50 = vsub.f32 %v1120_v0, %v559_v43 }
  0x1a   : > { %235 = vrot.lane.b32.xlu0 %v1137_v6, %s1078_s20  ;;  %1010 = vtanh.f32 %v613_v28  ;;  %v561_v58 = vsel %vm552_vm1, %v559_v43, %v560_v48  ;;  %v599_v16 = vrot.slane %v1141_v8, 7  ;;  %v598_v18 = vrot.slane %v1156_v13, 7 }
  0x1b   : > { %1012 = vtanh.f32 %v575_v30  ;;  %v578_v56 = vmul.f32 0.5, %v572_v50  ;;  %v573_v5 = vsub.f32 %v1131_v3, %v561_v58 }
  0x1c   : > { %1014 = vtanh.f32 %v614_v32  ;;  %v600_v24 = vsel %vm552_vm1, %v598_v18, %v599_v16  ;;  %v611_v25 = vsub.f32 %v1156_v13, %v598_v18 }
  0x1d   : > { %v1007_v37 = vpop.eup %1006  ;;  %1016 = vtanh.f32 %v577_v38  ;;  %v579_v20 = vmul.f32 0.5, %v573_v5  ;;  %v612_v27 = vsub.f32 %v1141_v8, %v600_v24 }
  0x1e   : > { %v1009_v39 = vpop.eup %1008  ;;  %1018 = vtanh.f32 %v615_v41  ;;  %v1183_v49 = vmul.f32 %v1007_v37, %v1007_v37  ;;  %v617_v32 = vmul.f32 0.5, %v611_v25 }
  0x1f   : > { %v1180_v46 = vmul.f32 %v1009_v39, %v1009_v39  ;;  %1020 = vtanh.f32 %v616_v44  ;;  %v618_v30 = vmul.f32 0.5, %v612_v27 }
  0x20   : > { %v1011_v40 = vpop.eup %1010  ;;  %1022 = vtanh.f32 %v578_v56 }
  0x21   : > { %285 = vrot.lane.b32.xlu2 %v1149_v11, %s1078_s20  ;;  %283 = vrot.lane.b32.xlu1 %v1139_v7, %s1078_s20  ;;  %v1013_v42 = vpop.eup %1012  ;;  %v625_v47 = vmul.f32 %v1011_v40, %v1011_v40  ;;  %1024 = vtanh.f32 %v579_v20 }
  0x22   : > { %281 = vrot.lane.b32.xlu0 %v1151_v12, %s1078_s20  ;;  %v1015_v45 = vpop.eup %1014  ;;  %v587_v51 = vmul.f32 %v1013_v42, %v1013_v42  ;;  %1026 = vtanh.f32 %v618_v30 }
  0x23   : > { %v626_v52 = vmul.f32 %v1015_v45, %v1015_v45  ;;  %v632_v53 = vmul.f32 %v625_v47, %v1180_v46  ;;  %v1017_v54 = vpop.eup %1016  ;;  %v634_v55 = vmul.f32 %v625_v47, %v1183_v49  ;;  %1028 = vtanh.f32 %v617_v32 }
  0x24   : > { %v1019_v59 = vpop.eup %1018  ;;  %v1190_v62 = vmul.f32 %v1017_v54, %v1017_v54 }
  0x25   : > { %v633_v57 = vmul.f32 %v626_v52, %v587_v51  ;;  %v1021_v60 = vpop.eup %1020  ;;  %v651_v61 = vsel %vm650_vm2, %v632_v53, 0.0  ;;  %v658_v63 = vsel %vm650_vm2, %v634_v55, 0.0  ;;  %v627_v14 = vmul.f32 %v1019_v59, %v1019_v59 }
  0x26   : > { %v628_v15 = vmul.f32 %v1021_v60, %v1021_v60  ;;  %v635_v17 = vmul.f32 %v626_v52, %v1190_v62  ;;  %v1023_v22 = vpop.eup %1022 }
  0x27   : > { %v655_v10 = vsel %vm654_vm3, %v633_v57, 0.0  ;;  %v638_v21 = vmul.f32 %v627_v14, %v1180_v46  ;;  %v1205_v29 = vmul.f32 %v1023_v22, %v1023_v22  ;;  %v640_v31 = vmul.f32 %v627_v14, %v1183_v49  ;;  %v1025_v35 = vpop.eup %1024 }
  0x28   : > { %v639_v19 = vmul.f32 %v628_v15, %v587_v51  ;;  %v661_v23 = vsel %vm654_vm3, %v635_v17, 0.0  ;;  %v641_v34 = vmul.f32 %v628_v15, %v1190_v62  ;;  %v1213_v39 = vmul.f32 %v1025_v35, %v1025_v35  ;;  %v1027_v40 = vpop.eup %1026 }
  0x29   : > { %291 = vrot.lane.b32.xlu2 %v1141_v8, %s1078_s20  ;;  %289 = vrot.lane.b32.xlu1 %v1156_v13, %s1078_s20  ;;  %v670_v28 = vsel %vm650_vm2, %v638_v21, 0.0  ;;  %v642_v33 = vmul.f32 %v627_v14, %v1205_v29  ;;  %v676_v36 = vsel %vm650_vm2, %v640_v31, 0.0  ;;  %v636_v41 = vmul.f32 %v625_v47, %v1205_v29  ;;  %v1029_v45 = vpop.eup %1028 }
  0x2a   : > { %287 = vrot.lane.b32.xlu0 %v1143_v9, %s1078_s20  ;;  %v673_v26 = vsel %vm654_vm3, %v639_v19, 0.0  ;;  %v679_v38 = vsel %vm654_vm3, %v641_v34, 0.0  ;;  %v1216_v42 = vmul.f32 %v1027_v40, %v1027_v40  ;;  %v637_v43 = vmul.f32 %v626_v52, %v1213_v39 }
  0x2b   : > { %v682_v37 = vsel %vm650_vm2, %v642_v33, 0.0  ;;  %v664_v48 = vsel %vm650_vm2, %v636_v41, 0.0  ;;  %v1223_v54 = vmul.f32 %v1029_v45, %v1029_v45  ;;  %v643_v47 = vmul.f32 %v628_v15, %v1213_v39 }
  0x2c   : > { %v645_v44 = vmul.f32 %v1216_v42, %v587_v51  ;;  %v667_v53 = vsel %vm654_vm3, %v637_v43, 0.0  ;;  %v647_v57 = vmul.f32 %v1216_v42, %v1190_v62 }
  0x2d   : > { %v644_v55 = vmul.f32 %v1223_v54, %v1180_v46  ;;  %v685_v52 = vsel %vm654_vm3, %v643_v47, 0.0  ;;  %v646_v56 = vmul.f32 %v1223_v54, %v1183_v49 }
  0x2e   : > { %v691_v50 = vsel %vm654_vm3, %v645_v44, 0.0  ;;  %v697_v59 = vsel %vm654_vm3, %v647_v57, 0.0 }
  0x2f   : > { %v688_v51 = vsel %vm650_vm2, %v644_v55, 0.0  ;;  %v694_v58 = vsel %vm650_vm2, %v646_v56, 0.0 }
  0x52   : > { %652 = vadd.xlane.f32.xlu2 %v651_v61 }
  0x53   : > { %659 = vadd.xlane.f32.xlu1 %v658_v63 }
  0x54   : > { %656 = vadd.xlane.f32.xlu0 %v655_v10 }
  0x5a   : > { %662 = vadd.xlane.f32.xlu2 %v661_v23 }
  0x5b   : > { %674 = vadd.xlane.f32.xlu1 %v673_v26 }
  0x5c   : > { %671 = vadd.xlane.f32.xlu0 %v670_v28 }
  0x62   : > { %677 = vadd.xlane.f32.xlu2 %v676_v36 }
  0x63   : > { %683 = vadd.xlane.f32.xlu1 %v682_v37 }
  0x64   : > { %680 = vadd.xlane.f32.xlu0 %v679_v38 }
  0x6a   : > { %665 = vadd.xlane.f32.xlu2 %v664_v48 }
  0x6b   : > { %692 = vadd.xlane.f32.xlu1 %v691_v50  ;;  %v242_v61 = vpop.permute.xlu2 %241 }
  0x6c   : > { %668 = vadd.xlane.f32.xlu0 %v667_v53  ;;  %v255_v23 = vsub.f32 %v1120_v0, %v242_v61 }
  0x6e   : > { %v261_v25 = vmul.f32 0.5, %v255_v23 }
  0x72   : > { %686 = vadd.xlane.f32.xlu2 %v685_v52 }
  0x73   : > { %v244_v15 = vpop.permute.xlu2 %243 }
  0x74   : > { %689 = vadd.xlane.f32.xlu0 %v688_v51  ;;  %v256_v21 = vsub.f32 %v1131_v3, %v244_v15 }
  0x76   : > { %v262_v24 = vmul.f32 0.5, %v256_v21 }
  0x7a   : > { %695 = vadd.xlane.f32.xlu2 %v694_v58 }
  0x7b   : > { %v286_v26 = vpop.permute.xlu2 %285 }
  0x7c   : > { %698 = vadd.xlane.f32.xlu0 %v697_v59 }
  0x83   : > { %v238_v60 = vpop.permute.xlu1 %237  ;;  %v292_v53 = vpop.permute.xlu2 %291 }
  0x84   : > { %v234_v46 = vpop.permute.xlu0 %233  ;;  %v253_v10 = vsub.f32 %v1122_v1, %v238_v60  ;;  %v304_v58 = vsub.f32 %v1141_v8, %v292_v53 }
  0x85   : > { %v251_v49 = vsub.f32 %v1124_v2, %v234_v46 }
  0x86   : > { %v259_v16 = vmul.f32 0.5, %v253_v10  ;;  %v310_v61 = vmul.f32 0.5, %v304_v58 }
  0x87   : > { %v257_v17 = vmul.f32 0.5, %v251_v49 }
  0x88   : > { %1030 = vtanh.f32 %v259_v16 }
  0x8b   : > { %v240_v63 = vpop.permute.xlu1 %239 }
  0x8c   : > { %v236_v5 = vpop.permute.xlu0 %235  ;;  %v254_v2 = vsub.f32 %v1133_v4, %v240_v63 }
  0x8d   : > { %v252_v14 = vsub.f32 %v1137_v6, %v236_v5 }
  0x8e   : > { %v260_v27 = vmul.f32 0.5, %v254_v2 }
  0x8f   : > { %v258_v62 = vmul.f32 0.5, %v252_v14 }
  0x91   : > { %1032 = vtanh.f32 %v258_v62 }
  0x92   : > { %1034 = vtanh.f32 %v257_v17 }
  0x93   : > { %v284_v18 = vpop.permute.xlu1 %283 }
  0x94   : > { %v300_v19 = vsub.f32 %v1139_v7, %v284_v18  ;;  %v282_v20 = vpop.permute.xlu0 %281  ;;  %v1031_v7 = vpop.eup %1030 }
  0x95   : > { %v299_v22 = vsub.f32 %v1151_v12, %v282_v20  ;;  %v301_v12 = vsub.f32 %v1149_v11, %v286_v26  ;;  %v271_v34 = vmul.f32 %v1031_v7, %v1031_v7 }
  0x96   : > { %v306_v1 = vmul.f32 0.5, %v300_v19 }
  0x97   : > { %v305_v6 = vmul.f32 0.5, %v299_v22  ;;  %v1033_v28 = vpop.eup %1032  ;;  %v307_v38 = vmul.f32 0.5, %v301_v12 }
  0x98   : > { %1036 = vtanh.f32 %v306_v1  ;;  %v1035_v30 = vpop.eup %1034  ;;  %v270_v4 = vmul.f32 %v1033_v28, %v1033_v28 }
  0x99   : > { %1038 = vtanh.f32 %v305_v6  ;;  %v269_v35 = vmul.f32 %v1035_v30, %v1035_v30 }
  0x9a   : > { %1040 = vtanh.f32 %v262_v24 }
  0x9b   : > { %1042 = vtanh.f32 %v261_v25  ;;  %v290_v52 = vpop.permute.xlu1 %289 }
  0x9c   : > { %v288_v3 = vpop.permute.xlu0 %287  ;;  %1044 = vtanh.f32 %v260_v27  ;;  %v303_v59 = vsub.f32 %v1156_v13, %v290_v52  ;;  %v488_v13 = vlaneseq }
  0x9d   : > { %v302_v0 = vsub.f32 %v1143_v9, %v288_v3 }
  0x9e   : > { %v1037_v31 = vpop.eup %1036  ;;  %v309_v63 = vmul.f32 0.5, %v303_v59  ;;  %v1260_v19 = vand.u32 127, %v488_v13 }
  0x9f   : > { %v1039_v32 = vpop.eup %1038  ;;  %v318_v33 = vmul.f32 %v1037_v31, %v1037_v31  ;;  %v308_v37 = vmul.f32 0.5, %v302_v0 }
  0xa0   : > { %v317_v36 = vmul.f32 %v1039_v32, %v1039_v32  ;;  %v1041_v44 = vpop.eup %1040  ;;  %v1263_v23 = vadd.s32 1, %v1260_v19  ;;  %v1269_v1 = vadd.s32 4294967289, %v1260_v19 }
  0xa1   : > { %v326_v40 = vmul.f32 %v318_v33, %v270_v4  ;;  %v1043_v11 = vpop.eup %1042  ;;  %1046 = vtanh.f32 %v308_v37  ;;  %v274_v45 = vmul.f32 %v1041_v44, %v1041_v44 }
  0xa2   : > { %v327_v41 = vmul.f32 %v317_v36, %v271_v34  ;;  %v325_v43 = vmul.f32 %v317_v36, %v269_v35  ;;  %v1045_v9 = vpop.eup %1044  ;;  %1048 = vtanh.f32 %v307_v38  ;;  %v273_v48 = vmul.f32 %v1043_v11, %v1043_v11 }
  0xa3   : > { %363 = vrot.lane.b32.xlu1 %v326_v40, %s1079_s21  ;;  %v272_v50 = vmul.f32 %v1045_v9, %v1045_v9  ;;  %v330_v51 = vmul.f32 %v318_v33, %v274_v45  ;;  %1050 = vtanh.f32 %v310_v61 }
  0xa4   : > { %365 = vrot.lane.b32.xlu2 %v327_v41, %s1079_s21  ;;  %361 = vrot.lane.b32.xlu0 %v325_v43, %s1079_s21  ;;  %v329_v47 = vmul.f32 %v317_v36, %v273_v48  ;;  %1052 = vtanh.f32 %v309_v63 }
  0xa5   : > { %v328_v56 = vmul.f32 %v318_v33, %v272_v50 }
  0xa7   : > { %v1047_v55 = vpop.eup %1046 }
  0xa8   : > { %v1049_v57 = vpop.eup %1048  ;;  %v320_v60 = vmul.f32 %v1047_v55, %v1047_v55 }
  0xa9   : > { %v319_v46 = vmul.f32 %v1049_v57, %v1049_v57  ;;  %v1051_v49 = vpop.eup %1050 }
  0xaa   : > { %v332_v5 = vmul.f32 %v320_v60, %v270_v4  ;;  %v336_v15 = vmul.f32 %v320_v60, %v274_v45  ;;  %v334_v16 = vmul.f32 %v320_v60, %v272_v50  ;;  %v1053_v62 = vpop.eup %1052  ;;  %v322_v17 = vmul.f32 %v1051_v49, %v1051_v49 }
  0xab   : > { %369 = vrot.lane.b32.xlu1 %v329_v47, %s1079_s21  ;;  %v333_v10 = vmul.f32 %v319_v46, %v271_v34  ;;  %v331_v14 = vmul.f32 %v319_v46, %v269_v35  ;;  %v335_v8 = vmul.f32 %v319_v46, %v273_v48  ;;  %v321_v18 = vmul.f32 %v1053_v62, %v1053_v62 }
  0xac   : > { %371 = vrot.lane.b32.xlu2 %v330_v51, %s1079_s21  ;;  %367 = vrot.lane.b32.xlu0 %v328_v56, %s1079_s21  ;;  %v338_v20 = vmul.f32 %v322_v17, %v270_v4  ;;  %v342_v28 = vmul.f32 %v322_v17, %v274_v45  ;;  %v340_v3 = vmul.f32 %v322_v17, %v272_v50 }
  0xad   : > { %v339_v21 = vmul.f32 %v321_v18, %v271_v34  ;;  %v337_v22 = vmul.f32 %v321_v18, %v269_v35  ;;  %v341_v7 = vmul.f32 %v321_v18, %v273_v48 }
  0xb3   : > { %375 = vrot.lane.b32.xlu1 %v332_v5, %s1079_s21 }
  0xb4   : > { %377 = vrot.lane.b32.xlu2 %v333_v10, %s1079_s21  ;;  %373 = vrot.lane.b32.xlu0 %v331_v14, %s1079_s21 }
  0xbb   : > { %381 = vrot.lane.b32.xlu1 %v335_v8, %s1079_s21 }
  0xbc   : > { %383 = vrot.lane.b32.xlu2 %v336_v15, %s1079_s21  ;;  %379 = vrot.lane.b32.xlu0 %v334_v16, %s1079_s21 }
  0xc3   : > { %387 = vrot.lane.b32.xlu1 %v338_v20, %s1079_s21 }
  0xc4   : > { %389 = vrot.lane.b32.xlu2 %v339_v21, %s1079_s21  ;;  %385 = vrot.lane.b32.xlu0 %v337_v22, %s1079_s21 }
  0xc5   : > { %v653_v2 = vpop.xlane.xlu2 %652 }
  0xc6   : > { %v725_v6 = vperm.slane %v653_v2, %v1263_v23  ;;  %v660_v24 = vpop.xlane.xlu1 %659 }
  0xc7   : > { %v657_v25 = vpop.xlane.xlu0 %656  ;;  %v730_v30 = vperm.slane %v660_v24, %v1263_v23 }
  0xc8   : > { %v727_v26 = vperm.slane %v657_v25, %v1269_v1 }
  0xca   : > { %v729_v27 = vsel %vm728_vm4, %v727_v26, %v725_v6 }
  0xcb   : > { %393 = vrot.lane.b32.xlu1 %v341_v7, %s1079_s21 }
  0xcc   : > { %395 = vrot.lane.b32.xlu2 %v342_v28, %s1079_s21  ;;  %391 = vrot.lane.b32.xlu0 %v340_v3, %s1079_s21 }
  0xcd   : > { %v663_v12 = vpop.xlane.xlu2 %662 }
  0xce   : > { %v731_v0 = vperm.slane %v663_v12, %v1269_v1  ;;  %v675_v31 = vpop.xlane.xlu1 %674 }
  0xcf   : > { %v672_v32 = vpop.xlane.xlu0 %671  ;;  %v737_v4 = vperm.slane %v675_v31, %v1269_v1 }
  0xd0   : > { %v736_v33 = vperm.slane %v672_v32, %v1263_v23  ;;  %v732_v34 = vsel %vm728_vm4, %v731_v0, %v730_v30 }
  0xd1   : > { %v754_v35 = vsel %vm519_vm0, %v732_v34, %v729_v27 }
  0xd2   : > { %v738_v36 = vsel %vm728_vm4, %v737_v4, %v736_v33 }
  0xd5   : > { %v678_v37 = vpop.xlane.xlu2 %677 }
  0xd6   : > { %v739_v38 = vperm.slane %v678_v37, %v1263_v23  ;;  %v684_v44 = vpop.xlane.xlu1 %683 }
  0xd7   : > { %v681_v40 = vpop.xlane.xlu0 %680  ;;  %v742_v52 = vperm.slane %v684_v44, %v1263_v23 }
  0xd8   : > { %v740_v41 = vperm.slane %v681_v40, %v1269_v1  ;;  %v648_v40 = vmul.f32 %v1223_v54, %v1205_v29 }
  0xda   : > { %v741_v43 = vsel %vm728_vm4, %v740_v41, %v739_v38 }
  0xdb   : > { %v756_v11 = vsel %vm519_vm0, %v741_v43, %v738_v36  ;;  %v700_v43 = vsel %vm650_vm2, %v648_v40, 0.0 }
  0xdd   : > { %v666_v9 = vpop.xlane.xlu2 %665 }
  0xde   : > { %v733_v45 = vperm.slane %v666_v9, %v1263_v23  ;;  %v693_v47 = vpop.xlane.xlu1 %692 }
  0xdf   : > { %v669_v48 = vpop.xlane.xlu0 %668  ;;  %v746_v57 = vperm.slane %v693_v47, %v1269_v1 }
  0xe0   : > { %v734_v50 = vperm.slane %v669_v48, %v1269_v1 }
  0xe2   : > { %v735_v53 = vsel %vm728_vm4, %v734_v50, %v733_v45  ;;  %v649_v50 = vmul.f32 %v1216_v42, %v1213_v39 }
  0xe3   : > { %v1292_v55 = vsel %vm521_vm5, %v735_v53, %v754_v35 }
  0xe4   : > { %v703_v29 = vsel %vm654_vm3, %v649_v50, 0.0  ;;  %v764_v54 = vsel %vm763_vm7, %v1292_v55, 0.0 }
  0xe5   : > { %v687_v51 = vpop.xlane.xlu2 %686 }
  0xe6   : > { %v743_v56 = vperm.slane %v687_v51, %v1269_v1  ;;  %v491_v51 = vadd.s32 4294967288, %v1260_v19 }
  0xe7   : > { %v690_v58 = vpop.xlane.xlu0 %689 }
  0xe8   : > { %v745_v59 = vperm.slane %v690_v58, %v1263_v23  ;;  %v744_v60 = vsel %vm728_vm4, %v743_v56, %v742_v52 }
  0xe9   : > { %v1300_v46 = vsel %vm521_vm5, %v744_v60, %v756_v11 }
  0xea   : > { %v747_v61 = vsel %vm728_vm4, %v746_v57, %v745_v59 }
  0xed   : > { %v696_v63 = vpop.xlane.xlu2 %695 }
  0xee   : > { %v748_v5 = vperm.slane %v696_v63, %v1263_v23 }
  0xef   : > { %v699_v10 = vpop.xlane.xlu0 %698 }
  0xf0   : > { %v749_v14 = vperm.slane %v699_v10, %v1269_v1 }
  0xf2   : > { %v750_v8 = vsel %vm728_vm4, %v749_v14, %v748_v5 }
  0xf3   : > { %v1307_v49 = vsel %vm519_vm0, %v750_v8, %v747_v61 }
  0xfe   : > { %v366_v15 = vpop.permute.xlu2 %365 }
  0xff   : > { %v422_v16 = vsel %vm415_vm6, %v366_v15, 0.0 }
 0x100   : > { %423 = vadd.xlane.f32.xlu2 %v422_v16 }
 0x106   : > { %v372_v13 = vpop.permute.xlu2 %371 }
 0x107   : > { %v431_v6 = vsel %vm415_vm6, %v372_v13, 0.0 }
 0x10e   : > { %v378_v22 = vpop.permute.xlu2 %377 }
 0x10f   : > { %v440_v27 = vsel %vm415_vm6, %v378_v22, 0.0 }
 0x115   : > { %v364_v62 = vpop.permute.xlu1 %363 }
 0x116   : > { %v362_v17 = vpop.permute.xlu0 %361  ;;  %v419_v18 = vsel %vm415_vm6, %v364_v62, 0.0  ;;  %v384_v30 = vpop.permute.xlu2 %383 }
 0x117   : > { %420 = vadd.xlane.f32.xlu1 %v419_v18  ;;  %v416_v20 = vsel %vm415_vm6, %v362_v17, 0.0  ;;  %v449_v31 = vsel %vm415_vm6, %v384_v30, 0.0  ;;  %v767_v17 = vsel %vm763_vm7, %v1300_v46, 0.0 }
 0x118   : > { %417 = vadd.xlane.f32.xlu0 %v416_v20 }
 0x11d   : > { %v370_v21 = vpop.permute.xlu1 %369 }
 0x11e   : > { %v368_v2 = vpop.permute.xlu0 %367  ;;  %v428_v24 = vsel %vm415_vm6, %v370_v21, 0.0  ;;  %v390_v33 = vpop.permute.xlu2 %389 }
 0x11f   : > { %432 = vadd.xlane.f32.xlu1 %v431_v6  ;;  %v425_v25 = vsel %vm415_vm6, %v368_v2, 0.0  ;;  %v458_v37 = vsel %vm415_vm6, %v390_v33, 0.0 }
 0x120   : > { %429 = vadd.xlane.f32.xlu0 %v428_v24  ;;  %426 = vadd.xlane.f32.xlu2 %v425_v25 }
 0x125   : > { %v376_v26 = vpop.permute.xlu1 %375 }
 0x126   : > { %v374_v7 = vpop.permute.xlu0 %373  ;;  %v437_v28 = vsel %vm415_vm6, %v376_v26, 0.0  ;;  %v396_v41 = vpop.permute.xlu2 %395 }
 0x127   : > { %441 = vadd.xlane.f32.xlu1 %v440_v27  ;;  %v434_v3 = vsel %vm415_vm6, %v374_v7, 0.0  ;;  %v467_v11 = vsel %vm415_vm6, %v396_v41, 0.0 }
 0x128   : > { %438 = vadd.xlane.f32.xlu0 %v437_v28  ;;  %435 = vadd.xlane.f32.xlu2 %v434_v3 }
 0x12d   : > { %v382_v12 = vpop.permute.xlu1 %381 }
 0x12e   : > { %v380_v0 = vpop.permute.xlu0 %379  ;;  %v446_v32 = vsel %vm415_vm6, %v382_v12, 0.0 }
 0x12f   : > { %450 = vadd.xlane.f32.xlu1 %v449_v31  ;;  %v443_v4 = vsel %vm415_vm6, %v380_v0, 0.0 }
 0x130   : > { %447 = vadd.xlane.f32.xlu0 %v446_v32  ;;  %444 = vadd.xlane.f32.xlu2 %v443_v4 }
 0x135   : > { %v388_v34 = vpop.permute.xlu1 %387 }
 0x136   : > { %v386_v35 = vpop.permute.xlu0 %385  ;;  %v455_v36 = vsel %vm415_vm6, %v388_v34, 0.0 }
 0x137   : > { %v452_v38 = vsel %vm415_vm6, %v386_v35, 0.0 }
 0x138   : > { %459 = vadd.xlane.f32.xlu0 %v458_v37  ;;  %456 = vadd.xlane.f32.xlu2 %v455_v36 }
 0x139   : > { %453 = vadd.xlane.f32.xlu1 %v452_v38 }
 0x13d   : > { %v394_v45 = vpop.permute.xlu1 %393 }
 0x13e   : > { %v392_v44 = vpop.permute.xlu0 %391  ;;  %v464_v48 = vsel %vm415_vm6, %v394_v45, 0.0 }
 0x13f   : > { %v461_v9 = vsel %vm415_vm6, %v392_v44, 0.0 }
 0x140   : > { %468 = vadd.xlane.f32.xlu2 %v467_v11  ;;  %701 = vadd.xlane.f32.xlu0 %v700_v43 }
 0x141   : > { %462 = vadd.xlane.f32.xlu1 %v461_v9 }
 0x149   : > { %465 = vadd.xlane.f32.xlu1 %v464_v48 }
 0x151   : > { %704 = vadd.xlane.f32.xlu1 %v703_v29 }
 0x159   : > { %765 = vadd.xlane.f32.xlu1 %v764_v54 }
 0x173   : > { %v424_v47 = vpop.xlane.xlu2 %423 }
 0x174   : > { %v495_v60 = vperm.slane %v424_v47, %v1260_v19 }
 0x18a   : > { %v421_v53 = vpop.xlane.xlu1 %420 }
 0x18b   : > { %v418_v52 = vpop.xlane.xlu0 %417  ;;  %v492_v56 = vperm.slane %v421_v53, %v491_v51 }
 0x18c   : > { %v490_v57 = vperm.slane %v418_v52, %v1260_v19 }
 0x18e   : > { %v494_v55 = vsel %vm493_vm8, %v492_v56, %v490_v57 }
 0x192   : > { %v433_v58 = vpop.xlane.xlu1 %432 }
 0x193   : > { %v499_v59 = vperm.slane %v433_v58, %v491_v51  ;;  %v427_v39 = vpop.xlane.xlu2 %426  ;;  %v430_v42 = vpop.xlane.xlu0 %429 }
 0x194   : > { %v496_v61 = vperm.slane %v427_v39, %v491_v51  ;;  %v498_v63 = vperm.slane %v430_v42, %v1260_v19 }
 0x196   : > { %v497_v5 = vsel %vm493_vm8, %v496_v61, %v495_v60  ;;  %v500_v10 = vsel %vm493_vm8, %v499_v59, %v498_v63 }
 0x197   : > { %v520_v14 = vsel %vm519_vm0, %v497_v5, %v494_v55 }
 0x198   : > { %v522_v8 = vsel %vm521_vm5, %v500_v10, %v520_v14 }
 0x199   : > { %v531_v15 = vsel %vm530_vm9, %v522_v8, 0.0 }
 0x19a   : > { %532 = vadd.xlane.f32.xlu2 %v531_v15  ;;  %v442_v16 = vpop.xlane.xlu1 %441 }
 0x19b   : > { %v436_v13 = vpop.xlane.xlu2 %435  ;;  %v439_v62 = vpop.xlane.xlu0 %438  ;;  %v504_v24 = vperm.slane %v442_v16, %v1260_v19 }
 0x19c   : > { %v501_v18 = vperm.slane %v436_v13, %v1260_v19  ;;  %v502_v20 = vperm.slane %v439_v62, %v491_v51 }
 0x19e   : > { %v503_v7 = vsel %vm493_vm8, %v502_v20, %v501_v18 }
 0x1a2   : > { %768 = vadd.xlane.f32.xlu2 %v767_v17  ;;  %v451_v21 = vpop.xlane.xlu1 %450 }
 0x1a3   : > { %v508_v22 = vperm.slane %v451_v21, %v491_v51  ;;  %v445_v2 = vpop.xlane.xlu2 %444  ;;  %v448_v6 = vpop.xlane.xlu0 %447 }
 0x1a4   : > { %v505_v25 = vperm.slane %v445_v2, %v491_v51  ;;  %v507_v26 = vperm.slane %v448_v6, %v1260_v19 }
 0x1a6   : > { %v506_v27 = vsel %vm493_vm8, %v505_v25, %v504_v24  ;;  %v509_v28 = vsel %vm493_vm8, %v508_v22, %v507_v26 }
 0x1a7   : > { %v523_v46 = vsel %vm519_vm0, %v506_v27, %v503_v7 }
 0x1a8   : > { %v524_v3 = vsel %vm521_vm5, %v509_v28, %v523_v46 }
 0x1a9   : > { %v534_v30 = vsel %vm530_vm9, %v524_v3, 0.0 }
 0x1aa   : > { %535 = vadd.xlane.f32.xlu0 %v534_v30 }
 0x1ab   : > { %v457_v0 = vpop.xlane.xlu2 %456  ;;  %v460_v32 = vpop.xlane.xlu0 %459 }
 0x1ac   : > { %v454_v12 = vpop.xlane.xlu1 %453  ;;  %v511_v33 = vperm.slane %v457_v0, %v491_v51  ;;  %v513_v35 = vperm.slane %v460_v32, %v1260_v19 }
 0x1ad   : > { %v510_v34 = vperm.slane %v454_v12, %v1260_v19 }
 0x1af   : > { %v512_v43 = vsel %vm493_vm8, %v511_v33, %v510_v34 }
 0x1b3   : > { %v469_v36 = vpop.xlane.xlu2 %468  ;;  %v702_v45 = vpop.xlane.xlu0 %701 }
 0x1b4   : > { %v463_v31 = vpop.xlane.xlu1 %462  ;;  %v517_v40 = vperm.slane %v469_v36, %v491_v51  ;;  %v751_v50 = vperm.slane %v702_v45, %v1263_v23 }
 0x1b5   : > { %v514_v4 = vperm.slane %v463_v31, %v491_v51  ;;  %v1080_v51 = vmov 0.0  }
 0x1b6   : > { %226 = vst.msk [vmem:[%s207_s25 + $0x4] sm:$0x7] %vm224_vm10, %v1080_v51 }
 0x1b7   : > { %v515_v37 = vsel %vm493_vm8, %v514_v4, %v513_v35  ;;  %225 = vst.msk [vmem:[%s207_s25] sm:$0x7] %vm224_vm10, %v1080_v51 }
 0x1b8   : > { %v525_v11 = vsel %vm519_vm0, %v515_v37, %v512_v43 }
 0x1bc   : > { %v466_v38 = vpop.xlane.xlu1 %465 }
 0x1bd   : > { %v516_v41 = vperm.slane %v466_v38, %v1260_v19  ;;  %v973_v59 = vld [vmem:[%s207_s25 + $0x4] sm:$0x7] }
 0x1be   : > { %v631_v14 = vld [vmem:[%s207_s25] sm:$0x7] }
 0x1bf   : > { %v518_v44 = vsel %vm493_vm8, %v517_v40, %v516_v41 }
 0x1c0   : > { %v526_v9 = vsel %vm521_vm5, %v518_v44, %v525_v11 }
 0x1c1   : > { %v537_v48 = vsel %vm530_vm9, %v526_v9, 0.0 }
 0x1c2   : > { %538 = vadd.xlane.f32.xlu0 %v537_v48 }
 0x1c4   : > { %v705_v29 = vpop.xlane.xlu1 %704 }
 0x1c5   : > { %v752_v54 = vperm.slane %v705_v29, %v1269_v1 }
 0x1c7   : > { %v753_v53 = vsel %vm728_vm4, %v752_v54, %v751_v50 }
 0x1c8   : > { %v759_v47 = vsel %vm521_vm5, %v753_v53, %v1307_v49 }
 0x1c9   : > { %v770_v52 = vsel %vm763_vm7, %v759_v47, 0.0 }
 0x1ca   : > { %771 = vadd.xlane.f32.xlu1 %v770_v52 }
 0x1cc   : > { %v766_v57 = vpop.xlane.xlu1 %765 }
 0x1cd   : > { %v776_v5 = vperm.slane %v766_v57, %v1260_v19 }
 0x20d   : > { %v533_v1 = vpop.xlane.xlu2 %532 }
 0x20e   : > { %v543_v49 = vperm.slane %v533_v1, %v1260_v19 }
 0x215   : > { %v769_v60 = vpop.xlane.xlu2 %768 }
 0x216   : > { %v777_v55 = vperm.slane %v769_v60, %v1260_v19 }
 0x218   : > { %v779_v15 = vsel %vm519_vm0, %v777_v55, %v776_v5 }
 0x21d   : > { %v536_v23 = vpop.xlane.xlu0 %535 }
 0x21e   : > { %v544_v56 = vperm.slane %v536_v23, %v1260_v19 }
 0x220   : > { %v546_v42 = vsel %vm519_vm0, %v544_v56, %v543_v49 }
 0x235   : > { %v539_v58 = vpop.xlane.xlu0 %538 }
 0x236   : > { %v545_v39 = vperm.slane %v539_v58, %v1260_v19 }
 0x238   : > { %v547_v61 = vsel %vm521_vm5, %v545_v39, %v546_v42 }
 0x239   : > { %v549_v63 = vadd.f32 %v973_v59, %v547_v61 }
 0x23b   : > { %974 = vst.msk [vmem:[%s207_s25 + $0x4] sm:$0x7] %vm224_vm10, %v549_v63 }
 0x23d   : > { %v772_v10 = vpop.xlane.xlu1 %771 }
 0x23e   : > { %v778_v8 = vperm.slane %v772_v10, %v1260_v19 }
 0x240   : > { %v780_v16 = vsel %vm521_vm5, %v778_v8, %v779_v15 }
 0x241   : > { %v782_v13 = vadd.f32 %v780_v16, %v631_v14 }
 0x243   : > { %783 = vst.msk [vmem:[%s207_s25] sm:$0x7] %vm224_vm10, %v782_v13 }
 0x244 PF: > { %s12_s11 = sadd.s32 1, %s1076_s11   ;;  %s1401_s9 = smov %s1072_s10 }
 0x245   : > { %p9_p5 = scmp.ge.s32.totalorder %s12_s11, 4   ;;  %s1402_s10 = smov %s1404_s12 }
 0x247   :  { %11 = sbr.rel (!%p9_p5) target bundleno = 2 (0x2), region = 72 }

// kernel: _exclusion_loss_impl.5
= control target key start
LH: loop header
LB: loop body
LE: loop exit
PB: predicated region body
PF: predicated region fallthrough
CT: control target
= control target key end

     0   :  { %s796_s9 = smov 0   ;;  %s798_s10 = smov 0   ;;  %s974_s0 = inlined_call_operand.vmem [shape: f32[2,3,4,4], index: 0, kind: input, shape index: {}]   ;;  %s975_s1 = inlined_call_operand.vmem [shape: f32[2,3,4,4], index: 1, kind: input, shape index: {}]   ;;  %s976_s2 = inlined_call_operand.vmem [shape: f32[2,2,3,3], index: 2, kind: output, shape index: {}]  }
   0x1   :  { %s800_s11 = smov 0  }
   0x2 LB: > { %s24_s12 = sadd.s32 1, %s772_s10  ;;  %p692_p0 = scmp.ge.s32.totalorder %s776_s11, 1  ;;  %s776_s11 = sphi %s800_s11, %s12_s11   ;;  %s772_s10 = sphi %s798_s10, %s978_s10   ;;  %s768_s9 = sphi %s796_s9, %s977_s9  }
   0x3   : > { %p26_p1 = scmp.ge.s32.totalorder %s24_s12, 2  ;;  %p144_p2 = scmp.lt.s32.totalorder %s776_s11, 3 }
   0x5   : > { %s980_s12 = smov (%p26_p1, %s24_s12), 0  ;;  %p145_p3 = pnand %p692_p0, %p144_p2 }
   0x6   : > { %p177_p4 = scmp.lt.s32.totalorder (!%p145_p3), %s768_s9, 1  ;;  %s778_s20 = smov (!%p145_p3), 1  }
   0x7   : > { %148 = sbr.rel (%p145_p3) target bundleno = 597 (0x255), region = 28  ;;  %s779_s21 = smov (!%p145_p3), 127  }
   0xc   : > { %s982_s9 = smov (!%p177_p4, %s768_s9), 1  ;;  %vm433_vm0 = vcmask 27649   ;;  %vm354_vm1 = vcmask 1041409   ;;  %vm356_vm2 = vcmask 1042434   ;;  %vm306_vm3 = vcmask 19456  }
   0xd   : > { %s702_s13 = smul.u32 12, %s982_s9  ;;  %vm208_vm4 = vcmask 18432   ;;  %vm365_vm5 = vcmask 26624   ;;  %s701_s22 = sshll.u32 %s982_s9, 3 }
   0xe   : > { %s197_s25 = scalar_lea.vmem %s976_s2, %s701_s22 }
   0xf   : > { %s192_s16 = scalar_lea.vmem %s975_s1, %s702_s13  ;;  %s184_s19 = scalar_lea.vmem %s974_s0, %s702_s13 }
  0x10   : > { %v823_v0 = vld [vmem:[%s192_s16] sm:$0xf]  ;;  %v827_v2 = vld [vmem:[%s192_s16 + $0x4] sm:$0xf]  ;;  %v834_v5 = vld [vmem:[%s184_s19 + $0x8] sm:$0xf] }
  0x11   : > { %v825_v1 = vld [vmem:[%s184_s19] sm:$0xf]  ;;  %238 = vrot.lane.b32.xlu1 %v823_v0, %s778_s20  ;;  %v406_v3 = vrot.slane %v827_v2, 7  ;;  %v832_v4 = vld [vmem:[%s184_s19 + $0x4] sm:$0xf]  ;;  %218 = vrot.lane.b32.xlu2 %v834_v5, %s778_s20  ;;  %v405_v9 = vrot.slane %v823_v0, 7 }
  0x12   : > { %214 = vrot.lane.b32.xlu0 %v825_v1, %s778_s20  ;;  %v388_v6 = vrot.slane %v832_v4, 7  ;;  %v838_v7 = vld [vmem:[%s192_s16 + $0x8] sm:$0xf]  ;;  %v387_v8 = vrot.slane %v825_v1, 7  ;;  %v389_v16 = vrot.slane %v834_v5, 7 }
  0x13   : > { %v412_v10 = vsub.f32 %v827_v2, %v406_v3  ;;  %v411_v12 = vsub.f32 %v823_v0, %v405_v9 }
  0x14   : > { %v393_v11 = vsub.f32 %v825_v1, %v387_v8  ;;  %v395_v17 = vsub.f32 %v834_v5, %v389_v16  ;;  %v394_v32 = vsub.f32 %v832_v4, %v388_v6 }
  0x15   : > { %v415_v13 = vmul.f32 0.5, %v412_v10  ;;  %v414_v15 = vmul.f32 0.5, %v411_v12 }
  0x16   : > { %v396_v14 = vmul.f32 0.5, %v393_v11  ;;  %v398_v19 = vmul.f32 0.5, %v395_v17  ;;  %v397_v34 = vmul.f32 0.5, %v394_v32  ;;  %v407_v17 = vrot.slane %v838_v7, 7 }
  0x17   : > { %730 = vtanh.f32 %v415_v13 }
  0x18   : > { %732 = vtanh.f32 %v396_v14 }
  0x19   : > { %240 = vrot.lane.b32.xlu1 %v827_v2, %s778_s20  ;;  %242 = vrot.lane.b32.xlu2 %v838_v7, %s778_s20  ;;  %734 = vtanh.f32 %v414_v15 }
  0x1a   : > { %216 = vrot.lane.b32.xlu0 %v832_v4, %s778_s20  ;;  %736 = vtanh.f32 %v398_v19 }
  0x1b   : > { %738 = vtanh.f32 %v397_v34 }
  0x1d   : > { %v731_v18 = vpop.eup %730 }
  0x1e   : > { %v733_v20 = vpop.eup %732  ;;  %v852_v23 = vmul.f32 %v731_v18, %v731_v18  ;;  %v413_v18 = vsub.f32 %v838_v7, %v407_v17 }
  0x1f   : > { %v735_v21 = vpop.eup %734  ;;  %v850_v22 = vmul.f32 %v733_v20, %v733_v20 }
  0x20   : > { %v420_v24 = vmul.f32 %v735_v21, %v735_v21  ;;  %v737_v27 = vpop.eup %736  ;;  %v416_v19 = vmul.f32 0.5, %v413_v18 }
  0x21   : > { %v427_v25 = vmul.f32 %v852_v23, %v850_v22  ;;  %v859_v30 = vmul.f32 %v737_v27, %v737_v27  ;;  %v739_v35 = vpop.eup %738 }
  0x22   : > { %v424_v26 = vmul.f32 %v420_v24, %v850_v22  ;;  %v864_v36 = vmul.f32 %v739_v35, %v739_v35 }
  0x23   : > { %v443_v28 = vsel %vm433_vm0, %v427_v25, 0.0  ;;  %v426_v31 = vmul.f32 %v420_v24, %v859_v30  ;;  %v429_v25 = vmul.f32 %v852_v23, %v859_v30 }
  0x24   : > { %v434_v29 = vsel %vm433_vm0, %v424_v26, 0.0  ;;  %v428_v37 = vmul.f32 %v852_v23, %v864_v36  ;;  %v425_v38 = vmul.f32 %v420_v24, %v864_v36  ;;  %v343_v26 = vlaneseq }
  0x25   : > { %v440_v33 = vsel %vm433_vm0, %v426_v31, 0.0 }
  0x26   : > { %v446_v39 = vsel %vm433_vm0, %v428_v37, 0.0  ;;  %v437_v40 = vsel %vm433_vm0, %v425_v38, 0.0  ;;  %v892_v31 = vand.u32 127, %v343_v26 }
  0x42   : > { %444 = vadd.xlane.f32.xlu2 %v443_v28  ;;  %v449_v28 = vsel %vm433_vm0, %v429_v25, 0.0 }
  0x43   : > { %438 = vadd.xlane.f32.xlu1 %v437_v40 }
  0x44   : > { %435 = vadd.xlane.f32.xlu0 %v434_v29 }
  0x4a   : > { %441 = vadd.xlane.f32.xlu2 %v440_v33 }
  0x4c   : > { %447 = vadd.xlane.f32.xlu0 %v446_v39 }
  0x6b   : > { %v219_v41 = vpop.permute.xlu2 %218 }
  0x6c   : > { %v225_v53 = vsub.f32 %v834_v5, %v219_v41 }
  0x6e   : > { %v228_v61 = vmul.f32 0.5, %v225_v53 }
  0x73   : > { %v243_v45 = vpop.permute.xlu2 %242 }
  0x74   : > { %v249_v49 = vsub.f32 %v838_v7, %v243_v45  ;;  %v895_v7 = vadd.s32 1, %v892_v31 }
  0x76   : > { %v252_v50 = vmul.f32 0.5, %v249_v49 }
  0x83   : > { %v239_v42 = vpop.permute.xlu1 %238 }
  0x84   : > { %v215_v43 = vpop.permute.xlu0 %214  ;;  %v247_v44 = vsub.f32 %v823_v0, %v239_v42 }
  0x85   : > { %v223_v46 = vsub.f32 %v825_v1, %v215_v43 }
  0x86   : > { %v250_v47 = vmul.f32 0.5, %v247_v44 }
  0x87   : > { %v226_v48 = vmul.f32 0.5, %v223_v46 }
  0x88   : > { %740 = vtanh.f32 %v250_v47 }
  0x89   : > { %742 = vtanh.f32 %v226_v48 }
  0x8a   : > { %744 = vtanh.f32 %v252_v50 }
  0x8b   : > { %v241_v51 = vpop.permute.xlu1 %240 }
  0x8c   : > { %v217_v52 = vpop.permute.xlu0 %216  ;;  %v248_v54 = vsub.f32 %v827_v2, %v241_v51 }
  0x8d   : > { %v224_v55 = vsub.f32 %v832_v4, %v217_v52 }
  0x8e   : > { %v741_v56 = vpop.eup %740  ;;  %v251_v57 = vmul.f32 0.5, %v248_v54 }
  0x8f   : > { %v227_v58 = vmul.f32 0.5, %v224_v55  ;;  %v743_v59 = vpop.eup %742  ;;  %v256_v60 = vmul.f32 %v741_v56, %v741_v56 }
  0x90   : > { %v232_v62 = vmul.f32 %v743_v59, %v743_v59  ;;  %746 = vtanh.f32 %v251_v57  ;;  %v745_v0 = vpop.eup %744 }
  0x91   : > { %748 = vtanh.f32 %v227_v58  ;;  %v258_v4 = vmul.f32 %v745_v0, %v745_v0 }
  0x92   : > { %v261_v63 = vmul.f32 %v256_v60, %v232_v62  ;;  %750 = vtanh.f32 %v228_v61 }
  0x93   : > { %v267_v15 = vmul.f32 %v258_v4, %v232_v62  ;;  %752 = vtanh.f32 %v416_v19 }
  0x94   : > { %279 = vrot.lane.b32.xlu0 %v261_v63, %s779_s21 }
  0x96   : > { %v747_v1 = vpop.eup %746 }
  0x97   : > { %v749_v2 = vpop.eup %748  ;;  %v257_v3 = vmul.f32 %v747_v1, %v747_v1 }
  0x98   : > { %v233_v5 = vmul.f32 %v749_v2, %v749_v2  ;;  %v751_v8 = vpop.eup %750 }
  0x99   : > { %v264_v6 = vmul.f32 %v257_v3, %v232_v62  ;;  %v234_v12 = vmul.f32 %v751_v8, %v751_v8  ;;  %v753_v20 = vpop.eup %752 }
  0x9a   : > { %v262_v9 = vmul.f32 %v256_v60, %v233_v5  ;;  %v265_v10 = vmul.f32 %v257_v3, %v233_v5  ;;  %v268_v11 = vmul.f32 %v258_v4, %v233_v5  ;;  %v422_v21 = vmul.f32 %v753_v20, %v753_v20 }
  0x9b   : > { %285 = vrot.lane.b32.xlu2 %v264_v6, %s779_s21  ;;  %v266_v13 = vmul.f32 %v257_v3, %v234_v12  ;;  %v263_v14 = vmul.f32 %v256_v60, %v234_v12  ;;  %v269_v16 = vmul.f32 %v258_v4, %v234_v12 }
  0x9c   : > { %281 = vrot.lane.b32.xlu1 %v262_v9, %s779_s21  ;;  %287 = vrot.lane.b32.xlu0 %v265_v10, %s779_s21  ;;  %v430_v24 = vmul.f32 %v422_v21, %v850_v22  ;;  %v431_v57 = vmul.f32 %v422_v21, %v864_v36  ;;  %v432_v0 = vmul.f32 %v422_v21, %v859_v30 }
  0x9e   : > { %v452_v27 = vsel %vm433_vm0, %v430_v24, 0.0  ;;  %v455_v59 = vsel %vm433_vm0, %v431_v57, 0.0  ;;  %v458_v1 = vsel %vm433_vm0, %v432_v0, 0.0 }
  0xa3   : > { %289 = vrot.lane.b32.xlu2 %v266_v13, %s779_s21 }
  0xa4   : > { %283 = vrot.lane.b32.xlu1 %v263_v14, %s779_s21  ;;  %291 = vrot.lane.b32.xlu0 %v267_v15, %s779_s21 }
  0xab   : > { %295 = vrot.lane.b32.xlu2 %v269_v16, %s779_s21 }
  0xb5   : > { %v445_v29 = vpop.xlane.xlu2 %444 }
  0xb6   : > { %v439_v32 = vpop.xlane.xlu1 %438  ;;  %v474_v49 = vperm.slane %v445_v29, %v895_v7 }
  0xb7   : > { %v472_v22 = vperm.slane %v439_v32, %v895_v7  ;;  %v436_v34 = vpop.xlane.xlu0 %435 }
  0xb8   : > { %v471_v35 = vperm.slane %v436_v34, %v895_v7 }
  0xba   : > { %v480_v37 = vsel %vm354_vm1, %v472_v22, %v471_v35 }
  0xbd   : > { %v442_v33 = vpop.xlane.xlu2 %441 }
  0xbe   : > { %v473_v23 = vperm.slane %v442_v33, %v895_v7 }
  0xbf   : > { %v448_v41 = vpop.xlane.xlu0 %447 }
  0xc0   : > { %v481_v38 = vsel %vm356_vm2, %v473_v23, %v480_v37  ;;  %v475_v50 = vperm.slane %v448_v41, %v895_v7 }
  0xc1   : > { %v489_v36 = vsel %vm208_vm4, %v481_v38, 0.0 }
  0xc2   : > { %v482_v56 = vsel %vm354_vm1, %v475_v50, %v474_v49 }
  0xce   : > { %453 = vadd.xlane.f32.xlu1 %v452_v27  ;;  %450 = vadd.xlane.f32.xlu0 %v449_v28 }
  0xe7   : > { %293 = vrot.lane.b32.xlu1 %v268_v11, %s779_s21 }
  0xf5   : > { %v286_v39 = vpop.permute.xlu2 %285 }
  0xf6   : > { %v316_v40 = vsel %vm306_vm3, %v286_v39, 0.0 }
  0xf7   : > { %317 = vadd.xlane.f32.xlu2 %v316_v40 }
  0xfd   : > { %v290_v48 = vpop.permute.xlu2 %289 }
  0xfe   : > { %v322_v53 = vsel %vm306_vm3, %v290_v48, 0.0 }
 0x105   : > { %v296_v58 = vpop.permute.xlu2 %295 }
 0x106   : > { %v280_v42 = vpop.permute.xlu0 %279  ;;  %v331_v60 = vsel %vm306_vm3, %v296_v58, 0.0 }
 0x107   : > { %v307_v43 = vsel %vm306_vm3, %v280_v42, 0.0 }
 0x108   : > { %308 = vadd.xlane.f32.xlu0 %v307_v43 }
 0x10e   : > { %v282_v44 = vpop.permute.xlu1 %281  ;;  %v288_v45 = vpop.permute.xlu0 %287 }
 0x10f   : > { %v319_v46 = vsel %vm306_vm3, %v288_v45, 0.0  ;;  %v310_v47 = vsel %vm306_vm3, %v282_v44, 0.0  ;;  %v780_v44 = vmov 0.0  }
 0x110   : > { %320 = vadd.xlane.f32.xlu2 %v319_v46  ;;  %210 = vst.msk [vmem:[%s197_s25 + $0x4] sm:$0x7] %vm208_vm4, %v780_v44 }
 0x111   : > { %311 = vadd.xlane.f32.xlu1 %v310_v47  ;;  %209 = vst.msk [vmem:[%s197_s25] sm:$0x7] %vm208_vm4, %v780_v44 }
 0x116   : > { %v284_v51 = vpop.permute.xlu1 %283  ;;  %v292_v52 = vpop.permute.xlu0 %291 }
 0x117   : > { %v325_v54 = vsel %vm306_vm3, %v292_v52, 0.0  ;;  %v313_v55 = vsel %vm306_vm3, %v284_v51, 0.0  ;;  %v697_v50 = vld [vmem:[%s197_s25 + $0x4] sm:$0x7] }
 0x118   : > { %323 = vadd.xlane.f32.xlu2 %v322_v53  ;;  %326 = vadd.xlane.f32.xlu0 %v325_v54 }
 0x119   : > { %314 = vadd.xlane.f32.xlu1 %v313_v55 }
 0x120   : > { %456 = vadd.xlane.f32.xlu2 %v455_v59  ;;  %332 = vadd.xlane.f32.xlu0 %v331_v60  ;;  %v423_v59 = vld [vmem:[%s197_s25] sm:$0x7] }
 0x141   : > { %v454_v61 = vpop.xlane.xlu1 %453  ;;  %v451_v3 = vpop.xlane.xlu0 %450 }
 0x142   : > { %v476_v21 = vperm.slane %v451_v3, %v895_v7  ;;  %v477_v38 = vperm.slane %v454_v61, %v895_v7 }
 0x144   : > { %v483_v24 = vsel %vm356_vm2, %v476_v21, %v482_v56 }
 0x145   : > { %v492_v25 = vsel %vm208_vm4, %v483_v24, 0.0 }
 0x159   : > { %v294_v62 = vpop.permute.xlu1 %293 }
 0x15a   : > { %v328_v63 = vsel %vm306_vm3, %v294_v62, 0.0 }
 0x15b   : > { %329 = vadd.xlane.f32.xlu1 %v328_v63 }
 0x163   : > { %459 = vadd.xlane.f32.xlu1 %v458_v1 }
 0x16a   : > { %v318_v2 = vpop.xlane.xlu2 %317 }
 0x16b   : > { %490 = vadd.xlane.f32.xlu1 %v489_v36  ;;  %v348_v10 = vperm.slane %v318_v2, %v892_v31 }
 0x17b   : > { %v309_v6 = vpop.xlane.xlu0 %308 }
 0x17c   : > { %v345_v30 = vperm.slane %v309_v6, %v892_v31 }
 0x183   : > { %v321_v4 = vpop.xlane.xlu2 %320 }
 0x184   : > { %v312_v5 = vpop.xlane.xlu1 %311  ;;  %v349_v8 = vperm.slane %v321_v4, %v892_v31 }
 0x185   : > { %v346_v9 = vperm.slane %v312_v5, %v892_v31 }
 0x186   : > { %v358_v15 = vsel %vm354_vm1, %v349_v8, %v348_v10 }
 0x187   : > { %v355_v17 = vsel %vm354_vm1, %v346_v9, %v345_v30 }
 0x18b   : > { %v324_v11 = vpop.xlane.xlu2 %323  ;;  %v327_v26 = vpop.xlane.xlu0 %326 }
 0x18c   : > { %v350_v12 = vperm.slane %v324_v11, %v892_v31  ;;  %v315_v13 = vpop.xlane.xlu1 %314  ;;  %v351_v29 = vperm.slane %v327_v26, %v892_v31 }
 0x18d   : > { %v347_v14 = vperm.slane %v315_v13, %v892_v31 }
 0x18e   : > { %v359_v16 = vsel %vm356_vm2, %v350_v12, %v358_v15 }
 0x18f   : > { %v369_v18 = vsel %vm365_vm5, %v359_v16, 0.0  ;;  %v357_v19 = vsel %vm356_vm2, %v347_v14, %v355_v17 }
 0x190   : > { %370 = vadd.xlane.f32.xlu0 %v369_v18  ;;  %v366_v20 = vsel %vm365_vm5, %v357_v19, 0.0 }
 0x191   : > { %367 = vadd.xlane.f32.xlu2 %v366_v20 }
 0x193   : > { %v333_v27 = vpop.xlane.xlu0 %332  ;;  %v457_v22 = vpop.xlane.xlu2 %456 }
 0x194   : > { %v353_v33 = vperm.slane %v333_v27, %v892_v31  ;;  %v478_v37 = vperm.slane %v457_v22, %v895_v7 }
 0x196   : > { %v484_v41 = vsel %vm354_vm1, %v478_v37, %v477_v38 }
 0x199   : > { %493 = vadd.xlane.f32.xlu2 %v492_v25 }
 0x1ce   : > { %v330_v28 = vpop.xlane.xlu1 %329 }
 0x1cf   : > { %v352_v32 = vperm.slane %v330_v28, %v892_v31 }
 0x1d1   : > { %v360_v34 = vsel %vm354_vm1, %v352_v32, %v351_v29 }
 0x1d2   : > { %v361_v23 = vsel %vm356_vm2, %v353_v33, %v360_v34 }
 0x1d3   : > { %v372_v35 = vsel %vm365_vm5, %v361_v23, 0.0 }
 0x1d4   : > { %373 = vadd.xlane.f32.xlu0 %v372_v35 }
 0x1d6   : > { %v460_v39 = vpop.xlane.xlu1 %459 }
 0x1d7   : > { %v479_v40 = vperm.slane %v460_v39, %v895_v7 }
 0x1d9   : > { %v485_v42 = vsel %vm356_vm2, %v479_v40, %v484_v41 }
 0x1da   : > { %v495_v43 = vsel %vm208_vm4, %v485_v42, 0.0 }
 0x1db   : > { %496 = vadd.xlane.f32.xlu1 %v495_v43 }
 0x1de   : > { %v491_v48 = vpop.xlane.xlu1 %490 }
 0x1df   : > { %v501_v57 = vperm.slane %v491_v48, %v892_v31 }
 0x203   : > { %v371_v45 = vpop.xlane.xlu0 %370 }
 0x204   : > { %v368_v46 = vpop.xlane.xlu2 %367  ;;  %v379_v7 = vperm.slane %v371_v45, %v892_v31 }
 0x205   : > { %v378_v47 = vperm.slane %v368_v46, %v892_v31 }
 0x207   : > { %v381_v52 = vsel %vm354_vm1, %v379_v7, %v378_v47 }
 0x20c   : > { %v494_v53 = vpop.xlane.xlu2 %493 }
 0x20d   : > { %v502_v56 = vperm.slane %v494_v53, %v892_v31 }
 0x20f   : > { %v504_v61 = vsel %vm354_vm1, %v502_v56, %v501_v57 }
 0x247   : > { %v374_v49 = vpop.xlane.xlu0 %373 }
 0x248   : > { %v380_v51 = vperm.slane %v374_v49, %v892_v31 }
 0x24a   : > { %v382_v54 = vsel %vm356_vm2, %v380_v51, %v381_v52 }
 0x24b   : > { %v384_v55 = vadd.f32 %v697_v50, %v382_v54 }
 0x24d   : > { %698 = vst.msk [vmem:[%s197_s25 + $0x4] sm:$0x7] %vm208_vm4, %v384_v55 }
 0x24e   : > { %v497_v58 = vpop.xlane.xlu1 %496 }
 0x24f   : > { %v503_v60 = vperm.slane %v497_v58, %v892_v31 }
 0x251   : > { %v505_v62 = vsel %vm356_vm2, %v503_v60, %v504_v61 }
 0x252   : > { %v507_v63 = vadd.f32 %v505_v62, %v423_v59 }
 0x254   : > { %508 = vst.msk [vmem:[%s197_s25] sm:$0x7] %vm208_vm4, %v507_v63 }
 0x255 PF: > { %s12_s11 = sadd.s32 1, %s776_s11   ;;  %s977_s9 = smov %s772_s10 }
 0x256   : > { %p9_p5 = scmp.ge.s32.totalorder %s12_s11, 4   ;;  %s978_s10 = smov %s980_s12 }
 0x258   :  { %11 = sbr.rel (!%p9_p5) target bundleno = 2 (0x2), region = 72 }

</bundles_post_ra>
